<compile_context>
chip_gen: v6e
topology: v6e:2x2x1
jax: 0.10.0
libtpu: 0.0.40
codegen_flags: <defaults>
</compile_context>

<pallas_src>
import jax
import jax.numpy as jnp
from jax.experimental import pallas as pl
from jax.experimental.pallas import tpu as pltpu


# --------------------------------------------------------------------------------------
# Kernel: one program per group of G graphs.  All dims pre-padded to 128 lanes / 128 rows.
# --------------------------------------------------------------------------------------
def relational_gnn_kernel(a_ref, x_ref,
                          w1_ref, b1_ref, w2_ref, b2_ref,
                          wc1_ref, bc1_ref, wc2_ref, bc2_ref,
                          out_ref, emb_ref):
    G, Np, Fp = x_ref.shape                    # G graphs, Np padded nodes, Fp padded in-features
    Ep = b1_ref.shape[1]                       # padded embed dim
    Cp = bc2_ref.shape[1]                      # padded n_classes
    R = a_ref.shape[2] // Np                   # num relations

    # ---- flatten graphs into the M dimension for all weight matmuls ----
    x = x_ref[...].reshape(G * Np, Fp)         # bf16, leading-dim merge (free)

    def stack_rel_blocks(m, g):
        """[G*Np, R*Ep] -> per-graph [R*Np, Ep]: relation column-blocks stacked along rows."""
        mg = m[g * Np:(g + 1) * Np, :]
        return jnp.concatenate([mg[:, r * Ep:(r + 1) * Ep] for r in range(R)], axis=0)

    # ---- conv1: one wide weight matmul + one fused-K adjacency matmul per graph, then ReLU ----
    xw = jnp.dot(x, w1_ref[...], preferred_element_type=jnp.float32)     # [G*Np, R*Ep] f32
    xw = xw.astype(jnp.bfloat16)
    h1_rows = []
    for g in range(G):
        s = jnp.dot(a_ref[g], stack_rel_blocks(xw, g),                   # [Np, R*Np] @ [R*Np, Ep]
                    preferred_element_type=jnp.float32) + b1_ref[...]
        h1_rows.append(jnp.maximum(s, 0.0))
    h1 = jnp.concatenate(h1_rows, axis=0).astype(jnp.bfloat16)           # [G*Np, Ep]
    # (F.dropout with training=False is identity)

    # ---- conv2: same structure, no ReLU; result is the returned embedding ----
    hw = jnp.dot(h1, w2_ref[...], preferred_element_type=jnp.float32)    # [G*Np, R*Ep]
    hw = hw.astype(jnp.bfloat16)
    out2_rows = []
    for g in range(G):
        o2 = jnp.dot(a_ref[g], stack_rel_blocks(hw, g),
                     preferred_element_type=jnp.float32) + b2_ref[...]   # [Np, Ep] f32
        emb_ref[g] = o2                                                  # lane-dense store
        out2_rows.append(o2)
    out2 = jnp.concatenate(out2_rows, axis=0).astype(jnp.bfloat16)       # [G*Np, Ep]

    # ---- classifier: Dropout(noop) -> Linear -> ReLU -> Linear, M = G*Np ----
    c = jnp.maximum(jnp.dot(out2, wc1_ref[...],
                            preferred_element_type=jnp.float32) + bc1_ref[...], 0.0)
    logits = jnp.dot(c.astype(jnp.bfloat16), wc2_ref[...],
                     preferred_element_type=jnp.float32) + bc2_ref[...]  # [G*Np, Cp]
    out_ref[...] = logits.reshape(G, Np, Cp)                             # lane-dense store


# --------------------------------------------------------------------------------------
# Glue (tiny, XLA side): per-relation normalized dense adjacency, GCNConv improved=True.
# One-hot einsum instead of a serialized scatter-add.
# --------------------------------------------------------------------------------------
def rel_normalized_adjacency(edge_index, edge_type, num_nodes, num_rels):
    """A_hat_r = D_r^{-1/2}(A_r + 2I)D_r^{-1/2} for r = 1..num_rels. Returns [R, N, N] f32."""
    # NOTE: assumes the input graph has no pre-existing self-loops / duplicate edges
    # (PyG gcn_norm uses add_remaining_self_loops).
    src, dst = edge_index[0], edge_index[1]
    dst_oh = jax.nn.one_hot(dst, num_nodes, dtype=jnp.float32)            # [E, N]
    src_oh = jax.nn.one_hot(src, num_nodes, dtype=jnp.float32)            # [E, N]
    rel_w = (edge_type[:, None] == (jnp.arange(num_rels) + 1)[None, :]).astype(jnp.float32)
    a = jnp.einsum('er,en,em->rnm', rel_w, dst_oh, src_oh)                # message flows src -> dst
    a = a + 2.0 * jnp.eye(num_nodes, dtype=jnp.float32)[None]             # improved=True self-loops
    deg = a.sum(axis=2)
    dinv = jnp.where(deg > 0, jax.lax.rsqrt(deg), 0.0)
    return dinv[:, :, None] * a * dinv[:, None, :]


def _round_up(v, m=128):
    return ((v + m - 1) // m) * m


def _pad_axis(a, axis, target):
    amount = target - a.shape[axis]
    if amount == 0:
        return a
    pad = [(0, 0)] * a.ndim
    pad[axis] = (0, amount)
    return jnp.pad(a, pad)


def _pick_group_size(batch, n_pad, target_rows=256):
    """Largest divisor g of batch with g*n_pad <= target_rows and (if possible) >= 2 grid steps."""
    cap = max(1, target_rows // n_pad)
    best = 1
    for g in range(1, batch + 1):
        if batch % g != 0 or g > cap:
            continue
        if batch >= 2 and g > 1 and batch // g < 2:
            continue                       # keep grid length >= 2 to feed both v7x TensorCores
        best = g
    return best


# --------------------------------------------------------------------------------------
# Wrapper: batches B graphs, G graphs per grid step, grid=(B//G,), parallel over groups.
# --------------------------------------------------------------------------------------
def relational_gnn_forward(x, edge_index, edge_type, params, node_drop, rng_key):
    """
    x:          [B, N, in_dim]  f32
    edge_index: [B, 2, E]       int32
    edge_type:  [B, E]          int32 (values in 1..num_rels)
    """
    B, N, in_dim = x.shape
    R, _, embed_dim = params["w1"].shape
    fc_dim = params["wc1"].shape[1]
    n_classes = params["wc2"].shape[1]

    # Pad every dim that lands on lanes/sublanes to 128: exact math, lane-dense loads/stores,
    # and the A matmul gets K = R*Np >= 256 instead of K = 16.
    Np = _round_up(N)
    Fp, Ep, Fcp, Cp = (_round_up(d) for d in (in_dim, embed_dim, fc_dim, n_classes))
    G = _pick_group_size(B, Np)

    # TODO(synk): for large graphs replace the dense O(Np^2) adjacency with an O(E)
    # scalar-prefetched edge-list formulation (PrefetchScalarGridSpec) inside the kernel, and
    # tile A_hat per relation (arbitrary grid axis + f32 accumulator) to fit v7x's 64 MiB VMEM.
    a_hat = jax.vmap(lambda ei, et: rel_normalized_adjacency(ei, et, Np, R))(edge_index, edge_type)
    # Relations concatenated along the contraction axis: A_cat[b, n, r*Np + m] = A_hat[b, r, n, m].
    a_cat = jnp.transpose(a_hat, (0, 2, 1, 3)).reshape(B, Np, R * Np).astype(jnp.bfloat16)

    xp = _pad_axis(_pad_axis(x, 1, Np), 2, Fp).astype(jnp.bfloat16)

    # Weights: pad, concatenate relations along the OUTPUT dim, ship in bf16.
    w1p = _pad_axis(_pad_axis(params["w1"], 1, Fp), 2, Ep)                 # [R, Fp, Ep]
    w1_cat = jnp.transpose(w1p, (1, 0, 2)).reshape(Fp, R * Ep).astype(jnp.bfloat16)
    w2p = _pad_axis(_pad_axis(params["w2"], 1, Ep), 2, Ep)                 # [R, Ep, Ep]
    w2_cat = jnp.transpose(w2p, (1, 0, 2)).reshape(Ep, R * Ep).astype(jnp.bfloat16)
    wc1p = _pad_axis(_pad_axis(params["wc1"], 0, Ep), 1, Fcp).astype(jnp.bfloat16)
    wc2p = _pad_axis(_pad_axis(params["wc2"], 0, Fcp), 1, Cp).astype(jnp.bfloat16)

    # Biases: pre-summed over relations (one f32 add per layer), kept f32 for the accumulators.
    b1s = _pad_axis(params["b1"].sum(axis=0)[None, :], 1, Ep)
    b2s = _pad_axis(params["b2"].sum(axis=0)[None, :], 1, Ep)
    bc1p = _pad_axis(params["bc1"][None, :], 1, Fcp)
    bc2p = _pad_axis(params["bc2"][None, :], 1, Cp)

    args = (a_cat, xp, w1_cat, b1s, w2_cat, b2s, wc1p, bc1p, wc2p, bc2p)

    def resident(arr):
        # weights / biases: same block every grid step -> never re-DMAed, stay resident in VMEM
        return pl.BlockSpec(arr.shape, lambda i, nd=arr.ndim: (0,) * nd)

    in_specs = [
        pl.BlockSpec((G, Np, R * Np), lambda i: (i, 0, 0)),   # A_cat, per graph group
        pl.BlockSpec((G, Np, Fp), lambda i: (i, 0, 0)),       # X, per graph group
        resident(w1_cat), resident(b1s), resident(w2_cat), resident(b2s),
        resident(wc1p), resident(bc1p), resident(wc2p), resident(bc2p),
    ]
    out_specs = (
        pl.BlockSpec((G, Np, Cp), lambda i: (i, 0, 0)),       # logits (padded, lane-dense)
        pl.BlockSpec((G, Np, Ep), lambda i: (i, 0, 0)),       # embedding (padded, lane-dense)
    )

    flops = B * Np * (2 * Fp * (R * Ep) + 2 * (R * Np) * Ep      # conv1: weight + fused-A matmuls
                      + 2 * Ep * (R * Ep) + 2 * (R * Np) * Ep    # conv2
                      + 2 * Ep * Fcp + 2 * Fcp * Cp)             # classifier
    bytes_accessed = (sum(int(a.size) * a.dtype.itemsize for a in args)
                      + B * Np * Cp * 4 + B * Np * Ep * 4)
    cost = pl.CostEstimate(flops=int(flops), transcendentals=0,
                           bytes_accessed=int(bytes_accessed))

    out_p, emb_p = pl.pallas_call(
        relational_gnn_kernel,
        out_shape=(
            jax.ShapeDtypeStruct((B, Np, Cp), jnp.float32),
            jax.ShapeDtypeStruct((B, Np, Ep), jnp.float32),
        ),
        grid_spec=pltpu.PrefetchScalarGridSpec(
            num_scalar_prefetch=0,
            grid=(B // G,),
            in_specs=in_specs,
            out_specs=out_specs,
        ),
        compiler_params=pltpu.CompilerParams(
            dimension_semantics=("parallel",),        # graph groups shard across TCs (v7x megacore)
            # 48 MiB: above v5e's 16 MiB scoped default, comfortably below v7x's 64 MiB physical.
            vmem_limit_bytes=48 * 1024 * 1024,
        ),
        cost_estimate=cost,
    )(*args)

    out = out_p[:, :N, :n_classes]
    emb = emb_p[:, :N, :embed_dim]

    # node_mask: produced every forward; only applied when training=True (not here).
    node_mask = jax.random.uniform(rng_key, (B, N, 1)) > node_drop
    return out, node_mask, emb


# --------------------------------------------------------------------------------------
# Pure-JAX references (f32 and a bf16-mirrored variant matching the kernel's casts)
# --------------------------------------------------------------------------------------
def _forward_math(a_hat, x, params, compute_dtype):
    def mm(p, q):
        return jnp.dot(p.astype(compute_dtype), q.astype(compute_dtype),
                       preferred_element_type=jnp.float32)

    num_rels = a_hat.shape[0]
    out1 = jnp.zeros((x.shape[0], params["w1"].shape[2]), jnp.float32)
    for r in range(num_rels):
        out1 = out1 + mm(a_hat[r], mm(x, params["w1"][r])) + params["b1"][r]
    h1 = jnp.maximum(out1, 0.0)
    out2 = jnp.zeros_like(out1)
    for r in range(num_rels):
        out2 = out2 + mm(a_hat[r], mm(h1, params["w2"][r])) + params["b2"][r]
    c = jnp.maximum(mm(out2, params["wc1"]) + params["bc1"], 0.0)
    out = mm(c, params["wc2"]) + params["bc2"]
    return out, out2


def reference_forward(x, edge_index, edge_type, params, num_rels, compute_dtype):
    def single(xb, eib, etb):
        a_hat = rel_normalized_adjacency(eib, etb, xb.shape[0], num_rels)
        return _forward_math(a_hat, xb, params, compute_dtype)
    return jax.vmap(single)(x, edge_index, edge_type)


def init_params(key, num_rels, in_dim, embed_dim, fc_dim, n_classes):
    ks = jax.random.split(key, 8)
    s = 0.1
    return {
        "w1": s * jax.random.normal(ks[0], (num_rels, in_dim, embed_dim), jnp.float32),
        "b1": s * jax.random.normal(ks[1], (num_rels, embed_dim), jnp.float32),
        "w2": s * jax.random.normal(ks[2], (num_rels, embed_dim, embed_dim), jnp.float32),
        "b2": s * jax.random.normal(ks[3], (num_rels, embed_dim), jnp.float32),
        "wc1": s * jax.random.normal(ks[4], (embed_dim, fc_dim), jnp.float32),
        "bc1": s * jax.random.normal(ks[5], (fc_dim,), jnp.float32),
        "wc2": s * jax.random.normal(ks[6], (fc_dim, n_classes), jnp.float32),
        "bc2": s * jax.random.normal(ks[7], (n_classes,), jnp.float32),
    }


if __name__ == "__main__":
    config = dict(num_rels=2, vocab_size=8, embed_dim=32, dropout=0.3,
                  fc_dim=32, node_drop=0.1, n_classes=4, model_name="rgcn")
    B, N = 4, 16                      # 4 graphs (2 per grid step), 16 nodes each
    E = 2 * N                         # bidirectional ring -> 32 edges per graph

    key = jax.random.PRNGKey(0)
    k_x, k_p, k_t, k_mask = jax.random.split(key, 4)

    x = jax.random.normal(k_x, (B, N, config["vocab_size"]), jnp.float32)

    # bidirectional ring graph (same topology per graph), random relation labels in {1..R}
    src = jnp.arange(N, dtype=jnp.int32)
    dst = (src + 1) % N
    ei_single = jnp.stack([jnp.concatenate([src, dst]),
                           jnp.concatenate([dst, src])], axis=0)          # [2, E]
    edge_index = jnp.broadcast_to(ei_single, (B, 2, E)).astype(jnp.int32)
    edge_type = jax.random.randint(k_t, (B, E), 1, config["num_rels"] + 1)

    params = init_params(k_p, config["num_rels"], config["vocab_size"],
                         config["embed_dim"], config["fc_dim"], config["n_classes"])

    out, node_mask, emb = relational_gnn_forward(
        x, edge_index, edge_type, params, config["node_drop"], k_mask)
    jax.block_until_ready((out, node_mask, emb))

    # correctness: bf16-mirrored reference (tight) and pure f32 reference (loose, bf16 MXU err)
    out_rb, emb_rb = reference_forward(x, edge_index, edge_type, params,
                                       config["num_rels"], jnp.bfloat16)
    out_rf, emb_rf = reference_forward(x, edge_index, edge_type, params,
                                       config["num_rels"], jnp.float32)

    assert out.shape == (B, N, config["n_classes"])
    assert emb.shape == (B, N, config["embed_dim"])
    assert node_mask.shape == (B, N, 1)
    assert jnp.allclose(out, out_rb, atol=1e-3, rtol=1e-3)
    assert jnp.allclose(emb, emb_rb, atol=1e-3, rtol=1e-3)
    assert jnp.allclose(out, out_rf, atol=3e-2, rtol=3e-2)
    assert jnp.allclose(emb, emb_rf, atol=3e-2, rtol=3e-2)

    print("KERNEL_OK")
</pallas_src>

<mosaic_0001>
module attributes {stable_mosaic.version = 11 : i64} {
  func.func @relational_gnn_kernel(%arg0: i32, %arg1: memref<2x128x256xbf16, #tpu.memory_space<vmem>>, %arg2: memref<2x128x128xbf16, #tpu.memory_space<vmem>>, %arg3: memref<128x256xbf16, #tpu.memory_space<vmem>>, %arg4: memref<1x128xf32, #tpu.memory_space<vmem>>, %arg5: memref<128x256xbf16, #tpu.memory_space<vmem>>, %arg6: memref<1x128xf32, #tpu.memory_space<vmem>>, %arg7: memref<128x128xbf16, #tpu.memory_space<vmem>>, %arg8: memref<1x128xf32, #tpu.memory_space<vmem>>, %arg9: memref<128x128xbf16, #tpu.memory_space<vmem>>, %arg10: memref<1x128xf32, #tpu.memory_space<vmem>>, %arg11: memref<2x128x128xf32, #tpu.memory_space<vmem>>, %arg12: memref<2x128x128xf32, #tpu.memory_space<vmem>>) attributes {dimension_semantics = [#tpu.dimension_semantics<parallel>], iteration_bounds = array<i64: 2>, scalar_prefetch = 0 : i64, scratch_operands = 0 : i64, tpu.core_type = #tpu.core_type<tc>, window_params = [{transform_indices = @transform_0, window_bounds = array<i64: 2, 128, 256>}, {transform_indices = @transform_1, window_bounds = array<i64: 2, 128, 128>}, {pipeline_mode = #tpu.pipeline_mode<synchronous>, transform_indices = @transform_2, window_bounds = array<i64: 128, 256>}, {pipeline_mode = #tpu.pipeline_mode<synchronous>, transform_indices = @transform_3, window_bounds = array<i64: 1, 128>}, {pipeline_mode = #tpu.pipeline_mode<synchronous>, transform_indices = @transform_4, window_bounds = array<i64: 128, 256>}, {pipeline_mode = #tpu.pipeline_mode<synchronous>, transform_indices = @transform_5, window_bounds = array<i64: 1, 128>}, {pipeline_mode = #tpu.pipeline_mode<synchronous>, transform_indices = @transform_6, window_bounds = array<i64: 128, 128>}, {pipeline_mode = #tpu.pipeline_mode<synchronous>, transform_indices = @transform_7, window_bounds = array<i64: 1, 128>}, {pipeline_mode = #tpu.pipeline_mode<synchronous>, transform_indices = @transform_8, window_bounds = array<i64: 128, 128>}, {pipeline_mode = #tpu.pipeline_mode<synchronous>, transform_indices = @transform_9, window_bounds = array<i64: 1, 128>}, {transform_indices = @transform_10, window_bounds = array<i64: 2, 128, 128>}, {transform_indices = @transform_11, window_bounds = array<i64: 2, 128, 128>}]} {
    %c0 = arith.constant 0 : index
    %c0_0 = arith.constant 0 : index
    %c0_1 = arith.constant 0 : index
    %0 = vector.load %arg2[%c0, %c0_0, %c0_1] : memref<2x128x128xbf16, #tpu.memory_space<vmem>>, vector<2x128x128xbf16>
    %1 = vector.shape_cast %0 : vector<2x128x128xbf16> to vector<256x128xbf16>
    %c0_2 = arith.constant 0 : index
    %c0_3 = arith.constant 0 : index
    %2 = vector.load %arg3[%c0_2, %c0_3] : memref<128x256xbf16, #tpu.memory_space<vmem>>, vector<128x256xbf16>
    %cst = arith.constant dense<0.000000e+00> : vector<256x256xf32>
    %3 = tpu.matmul %1, %2, %cst {dimension_numbers = #tpu.dot_dimension_numbers<[1], [0], [0], [1], [0, 0, 1, 1], [], []>} : vector<256x128xbf16>, vector<128x256xbf16>, vector<256x256xf32> -> vector<256x256xf32>
    %4 = arith.truncf %3 : vector<256x256xf32> to vector<256x256xbf16>
    %c0_4 = arith.constant 0 : index
    %c0_5 = arith.constant 0 : index
    %c0_6 = arith.constant 0 : index
    %5 = vector.load %arg1[%c0_4, %c0_5, %c0_6] : memref<2x128x256xbf16, #tpu.memory_space<vmem>>, vector<1x128x256xbf16>
    %6 = vector.shape_cast %5 : vector<1x128x256xbf16> to vector<128x256xbf16>
    %7 = vector.extract_strided_slice %4 {offsets = [0, 0], sizes = [128, 256], strides = [1, 1]} : vector<256x256xbf16> to vector<128x256xbf16>
    %8 = vector.extract_strided_slice %7 {offsets = [0, 0], sizes = [128, 128], strides = [1, 1]} : vector<128x256xbf16> to vector<128x128xbf16>
    %9 = vector.extract_strided_slice %7 {offsets = [0, 128], sizes = [128, 128], strides = [1, 1]} : vector<128x256xbf16> to vector<128x128xbf16>
    %10 = tpu.concatenate %8, %9 in 0 : vector<128x128xbf16>, vector<128x128xbf16> -> vector<256x128xbf16>
    %cst_7 = arith.constant dense<0.000000e+00> : vector<128x128xf32>
    %11 = tpu.matmul %6, %10, %cst_7 {dimension_numbers = #tpu.dot_dimension_numbers<[1], [0], [0], [1], [0, 0, 1, 1], [], []>} : vector<128x256xbf16>, vector<256x128xbf16>, vector<128x128xf32> -> vector<128x128xf32>
    %c0_8 = arith.constant 0 : index
    %c0_9 = arith.constant 0 : index
    %12 = vector.load %arg4[%c0_8, %c0_9] : memref<1x128xf32, #tpu.memory_space<vmem>>, vector<1x128xf32>
    %13 = vector.broadcast %12 : vector<1x128xf32> to vector<128x128xf32>
    %14 = arith.addf %11, %13 : vector<128x128xf32>
    %cst_10 = arith.constant 0.000000e+00 : f32
    %15 = vector.broadcast %cst_10 : f32 to vector<128x128xf32>
    %16 = arith.maximumf %14, %15 : vector<128x128xf32>
    %c1 = arith.constant 1 : index
    %c0_11 = arith.constant 0 : index
    %c0_12 = arith.constant 0 : index
    %17 = vector.load %arg1[%c1, %c0_11, %c0_12] : memref<2x128x256xbf16, #tpu.memory_space<vmem>>, vector<1x128x256xbf16>
    %18 = vector.shape_cast %17 : vector<1x128x256xbf16> to vector<128x256xbf16>
    %19 = vector.extract_strided_slice %4 {offsets = [128, 0], sizes = [128, 256], strides = [1, 1]} : vector<256x256xbf16> to vector<128x256xbf16>
    %20 = vector.extract_strided_slice %19 {offsets = [0, 0], sizes = [128, 128], strides = [1, 1]} : vector<128x256xbf16> to vector<128x128xbf16>
    %21 = vector.extract_strided_slice %19 {offsets = [0, 128], sizes = [128, 128], strides = [1, 1]} : vector<128x256xbf16> to vector<128x128xbf16>
    %22 = tpu.concatenate %20, %21 in 0 : vector<128x128xbf16>, vector<128x128xbf16> -> vector<256x128xbf16>
    %cst_13 = arith.constant dense<0.000000e+00> : vector<128x128xf32>
    %23 = tpu.matmul %18, %22, %cst_13 {dimension_numbers = #tpu.dot_dimension_numbers<[1], [0], [0], [1], [0, 0, 1, 1], [], []>} : vector<128x256xbf16>, vector<256x128xbf16>, vector<128x128xf32> -> vector<128x128xf32>
    %c0_14 = arith.constant 0 : index
    %c0_15 = arith.constant 0 : index
    %24 = vector.load %arg4[%c0_14, %c0_15] : memref<1x128xf32, #tpu.memory_space<vmem>>, vector<1x128xf32>
    %25 = vector.broadcast %24 : vector<1x128xf32> to vector<128x128xf32>
    %26 = arith.addf %23, %25 : vector<128x128xf32>
    %cst_16 = arith.constant 0.000000e+00 : f32
    %27 = vector.broadcast %cst_16 : f32 to vector<128x128xf32>
    %28 = arith.maximumf %26, %27 : vector<128x128xf32>
    %29 = tpu.concatenate %16, %28 in 0 : vector<128x128xf32>, vector<128x128xf32> -> vector<256x128xf32>
    %30 = arith.truncf %29 : vector<256x128xf32> to vector<256x128xbf16>
    %c0_17 = arith.constant 0 : index
    %c0_18 = arith.constant 0 : index
    %31 = vector.load %arg5[%c0_17, %c0_18] : memref<128x256xbf16, #tpu.memory_space<vmem>>, vector<128x256xbf16>
    %cst_19 = arith.constant dense<0.000000e+00> : vector<256x256xf32>
    %32 = tpu.matmul %30, %31, %cst_19 {dimension_numbers = #tpu.dot_dimension_numbers<[1], [0], [0], [1], [0, 0, 1, 1], [], []>} : vector<256x128xbf16>, vector<128x256xbf16>, vector<256x256xf32> -> vector<256x256xf32>
    %33 = arith.truncf %32 : vector<256x256xf32> to vector<256x256xbf16>
    %c0_20 = arith.constant 0 : index
    %c0_21 = arith.constant 0 : index
    %c0_22 = arith.constant 0 : index
    %34 = vector.load %arg1[%c0_20, %c0_21, %c0_22] : memref<2x128x256xbf16, #tpu.memory_space<vmem>>, vector<1x128x256xbf16>
    %35 = vector.shape_cast %34 : vector<1x128x256xbf16> to vector<128x256xbf16>
    %36 = vector.extract_strided_slice %33 {offsets = [0, 0], sizes = [128, 256], strides = [1, 1]} : vector<256x256xbf16> to vector<128x256xbf16>
    %37 = vector.extract_strided_slice %36 {offsets = [0, 0], sizes = [128, 128], strides = [1, 1]} : vector<128x256xbf16> to vector<128x128xbf16>
    %38 = vector.extract_strided_slice %36 {offsets = [0, 128], sizes = [128, 128], strides = [1, 1]} : vector<128x256xbf16> to vector<128x128xbf16>
    %39 = tpu.concatenate %37, %38 in 0 : vector<128x128xbf16>, vector<128x128xbf16> -> vector<256x128xbf16>
    %cst_23 = arith.constant dense<0.000000e+00> : vector<128x128xf32>
    %40 = tpu.matmul %35, %39, %cst_23 {dimension_numbers = #tpu.dot_dimension_numbers<[1], [0], [0], [1], [0, 0, 1, 1], [], []>} : vector<128x256xbf16>, vector<256x128xbf16>, vector<128x128xf32> -> vector<128x128xf32>
    %c0_24 = arith.constant 0 : index
    %c0_25 = arith.constant 0 : index
    %41 = vector.load %arg6[%c0_24, %c0_25] : memref<1x128xf32, #tpu.memory_space<vmem>>, vector<1x128xf32>
    %42 = vector.broadcast %41 : vector<1x128xf32> to vector<128x128xf32>
    %43 = arith.addf %40, %42 : vector<128x128xf32>
    %c0_26 = arith.constant 0 : index
    %c0_27 = arith.constant 0 : index
    %c0_28 = arith.constant 0 : index
    %44 = vector.load %arg12[%c0_26, %c0_27, %c0_28] : memref<2x128x128xf32, #tpu.memory_space<vmem>>, vector<1x128x128xf32>
    %45 = vector.shape_cast %44 : vector<1x128x128xf32> to vector<128x128xf32>
    %46 = vector.shape_cast %43 : vector<128x128xf32> to vector<1x128x128xf32>
    tpu.vector_store %arg12[%c0_26, %c0_27, %c0_28], %46 {strides = array<i32>} : memref<2x128x128xf32, #tpu.memory_space<vmem>>, vector<1x128x128xf32>,
    %c1_29 = arith.constant 1 : index
    %c0_30 = arith.constant 0 : index
    %c0_31 = arith.constant 0 : index
    %47 = vector.load %arg1[%c1_29, %c0_30, %c0_31] : memref<2x128x256xbf16, #tpu.memory_space<vmem>>, vector<1x128x256xbf16>
    %48 = vector.shape_cast %47 : vector<1x128x256xbf16> to vector<128x256xbf16>
    %49 = vector.extract_strided_slice %33 {offsets = [128, 0], sizes = [128, 256], strides = [1, 1]} : vector<256x256xbf16> to vector<128x256xbf16>
    %50 = vector.extract_strided_slice %49 {offsets = [0, 0], sizes = [128, 128], strides = [1, 1]} : vector<128x256xbf16> to vector<128x128xbf16>
    %51 = vector.extract_strided_slice %49 {offsets = [0, 128], sizes = [128, 128], strides = [1, 1]} : vector<128x256xbf16> to vector<128x128xbf16>
    %52 = tpu.concatenate %50, %51 in 0 : vector<128x128xbf16>, vector<128x128xbf16> -> vector<256x128xbf16>
    %cst_32 = arith.constant dense<0.000000e+00> : vector<128x128xf32>
    %53 = tpu.matmul %48, %52, %cst_32 {dimension_numbers = #tpu.dot_dimension_numbers<[1], [0], [0], [1], [0, 0, 1, 1], [], []>} : vector<128x256xbf16>, vector<256x128xbf16>, vector<128x128xf32> -> vector<128x128xf32>
    %c0_33 = arith.constant 0 : index
    %c0_34 = arith.constant 0 : index
    %54 = vector.load %arg6[%c0_33, %c0_34] : memref<1x128xf32, #tpu.memory_space<vmem>>, vector<1x128xf32>
    %55 = vector.broadcast %54 : vector<1x128xf32> to vector<128x128xf32>
    %56 = arith.addf %53, %55 : vector<128x128xf32>
    %c1_35 = arith.constant 1 : index
    %c0_36 = arith.constant 0 : index
    %c0_37 = arith.constant 0 : index
    %57 = vector.load %arg12[%c1_35, %c0_36, %c0_37] : memref<2x128x128xf32, #tpu.memory_space<vmem>>, vector<1x128x128xf32>
    %58 = vector.shape_cast %57 : vector<1x128x128xf32> to vector<128x128xf32>
    %59 = vector.shape_cast %56 : vector<128x128xf32> to vector<1x128x128xf32>
    tpu.vector_store %arg12[%c1_35, %c0_36, %c0_37], %59 {strides = array<i32>} : memref<2x128x128xf32, #tpu.memory_space<vmem>>, vector<1x128x128xf32>,
    %60 = tpu.concatenate %43, %56 in 0 : vector<128x128xf32>, vector<128x128xf32> -> vector<256x128xf32>
    %61 = arith.truncf %60 : vector<256x128xf32> to vector<256x128xbf16>
    %c0_38 = arith.constant 0 : index
    %c0_39 = arith.constant 0 : index
    %62 = vector.load %arg7[%c0_38, %c0_39] : memref<128x128xbf16, #tpu.memory_space<vmem>>, vector<128x128xbf16>
    %cst_40 = arith.constant dense<0.000000e+00> : vector<256x128xf32>
    %63 = tpu.matmul %61, %62, %cst_40 {dimension_numbers = #tpu.dot_dimension_numbers<[1], [0], [0], [1], [0, 0, 1, 1], [], []>} : vector<256x128xbf16>, vector<128x128xbf16>, vector<256x128xf32> -> vector<256x128xf32>
    %c0_41 = arith.constant 0 : index
    %c0_42 = arith.constant 0 : index
    %64 = vector.load %arg8[%c0_41, %c0_42] : memref<1x128xf32, #tpu.memory_space<vmem>>, vector<1x128xf32>
    %65 = vector.broadcast %64 : vector<1x128xf32> to vector<256x128xf32>
    %66 = arith.addf %63, %65 : vector<256x128xf32>
    %cst_43 = arith.constant 0.000000e+00 : f32
    %67 = vector.broadcast %cst_43 : f32 to vector<256x128xf32>
    %68 = arith.maximumf %66, %67 : vector<256x128xf32>
    %69 = arith.truncf %68 : vector<256x128xf32> to vector<256x128xbf16>
    %c0_44 = arith.constant 0 : index
    %c0_45 = arith.constant 0 : index
    %70 = vector.load %arg9[%c0_44, %c0_45] : memref<128x128xbf16, #tpu.memory_space<vmem>>, vector<128x128xbf16>
    %cst_46 = arith.constant dense<0.000000e+00> : vector<256x128xf32>
    %71 = tpu.matmul %69, %70, %cst_46 {dimension_numbers = #tpu.dot_dimension_numbers<[1], [0], [0], [1], [0, 0, 1, 1], [], []>} : vector<256x128xbf16>, vector<128x128xbf16>, vector<256x128xf32> -> vector<256x128xf32>
    %c0_47 = arith.constant 0 : index
    %c0_48 = arith.constant 0 : index
    %72 = vector.load %arg10[%c0_47, %c0_48] : memref<1x128xf32, #tpu.memory_space<vmem>>, vector<1x128xf32>
    %73 = vector.broadcast %72 : vector<1x128xf32> to vector<256x128xf32>
    %74 = arith.addf %71, %73 : vector<256x128xf32>
    %75 = vector.shape_cast %74 : vector<256x128xf32> to vector<2x128x128xf32>
    %c0_49 = arith.constant 0 : index
    %c0_50 = arith.constant 0 : index
    %c0_51 = arith.constant 0 : index
    %76 = vector.load %arg11[%c0_49, %c0_50, %c0_51] : memref<2x128x128xf32, #tpu.memory_space<vmem>>, vector<2x128x128xf32>
    tpu.vector_store %arg11[%c0_49, %c0_50, %c0_51], %75 {strides = array<i32>} : memref<2x128x128xf32, #tpu.memory_space<vmem>>, vector<2x128x128xf32>,
    return
  }
  func.func @transform_0(%arg0: i32) -> (i32, i32, i32) {
    %c0_i32 = arith.constant 0 : i32
    %c0_i32_0 = arith.constant 0 : i32
    %c0_i32_1 = arith.constant 0 : i32
    return %arg0, %c0_i32, %c0_i32_0 : i32, i32, i32
  }
  func.func @transform_1(%arg0: i32) -> (i32, i32, i32) {
    %c0_i32 = arith.constant 0 : i32
    %c0_i32_0 = arith.constant 0 : i32
    %c0_i32_1 = arith.constant 0 : i32
    return %arg0, %c0_i32, %c0_i32_0 : i32, i32, i32
  }
  func.func @transform_2(%arg0: i32) -> (i32, i32) {
    %c0_i32 = arith.constant 0 : i32
    %c0_i32_0 = arith.constant 0 : i32
    %c0_i32_1 = arith.constant 0 : i32
    return %c0_i32, %c0_i32_0 : i32, i32
  }
  func.func @transform_3(%arg0: i32) -> (i32, i32) {
    %c0_i32 = arith.constant 0 : i32
    %c0_i32_0 = arith.constant 0 : i32
    %c0_i32_1 = arith.constant 0 : i32
    return %c0_i32, %c0_i32_0 : i32, i32
  }
  func.func @transform_4(%arg0: i32) -> (i32, i32) {
    %c0_i32 = arith.constant 0 : i32
    %c0_i32_0 = arith.constant 0 : i32
    %c0_i32_1 = arith.constant 0 : i32
    return %c0_i32, %c0_i32_0 : i32, i32
  }
  func.func @transform_5(%arg0: i32) -> (i32, i32) {
    %c0_i32 = arith.constant 0 : i32
    %c0_i32_0 = arith.constant 0 : i32
    %c0_i32_1 = arith.constant 0 : i32
    return %c0_i32, %c0_i32_0 : i32, i32
  }
  func.func @transform_6(%arg0: i32) -> (i32, i32) {
    %c0_i32 = arith.constant 0 : i32
    %c0_i32_0 = arith.constant 0 : i32
    %c0_i32_1 = arith.constant 0 : i32
    return %c0_i32, %c0_i32_0 : i32, i32
  }
  func.func @transform_7(%arg0: i32) -> (i32, i32) {
    %c0_i32 = arith.constant 0 : i32
    %c0_i32_0 = arith.constant 0 : i32
    %c0_i32_1 = arith.constant 0 : i32
    return %c0_i32, %c0_i32_0 : i32, i32
  }
  func.func @transform_8(%arg0: i32) -> (i32, i32) {
    %c0_i32 = arith.constant 0 : i32
    %c0_i32_0 = arith.constant 0 : i32
    %c0_i32_1 = arith.constant 0 : i32
    return %c0_i32, %c0_i32_0 : i32, i32
  }
  func.func @transform_9(%arg0: i32) -> (i32, i32) {
    %c0_i32 = arith.constant 0 : i32
    %c0_i32_0 = arith.constant 0 : i32
    %c0_i32_1 = arith.constant 0 : i32
    return %c0_i32, %c0_i32_0 : i32, i32
  }
  func.func @transform_10(%arg0: i32) -> (i32, i32, i32) {
    %c0_i32 = arith.constant 0 : i32
    %c0_i32_0 = arith.constant 0 : i32
    %c0_i32_1 = arith.constant 0 : i32
    return %arg0, %c0_i32, %c0_i32_0 : i32, i32, i32
  }
  func.func @transform_11(%arg0: i32) -> (i32, i32, i32) {
    %c0_i32 = arith.constant 0 : i32
    %c0_i32_0 = arith.constant 0 : i32
    %c0_i32_1 = arith.constant 0 : i32
    return %arg0, %c0_i32, %c0_i32_0 : i32, i32, i32
  }
}

</mosaic_0001>

<bundles_post_ra>
// kernel: tpu_custom_call.1
= control target key start
LH: loop header
LB: loop body
LE: loop exit
PB: predicated region body
PF: predicated region fallthrough
CT: control target
= control target key end

     0   :  { %s4956_s0 = inlined_call_operand.hbm [shape: bf16[4,128,256], index: 0, kind: input, shape index: {}]   ;;  %s4957_s1 = inlined_call_operand.hbm [shape: bf16[4,128,128], index: 1, kind: input, shape index: {}]   ;;  %s4958_s2 = inlined_call_operand.hbm [shape: bf16[128,256], index: 2, kind: input, shape index: {}]   ;;  %s4959_s3 = inlined_call_operand.vmem [shape: f32[1,128], index: 3, kind: input, shape index: {}]   ;;  %s4960_s4 = inlined_call_operand.hbm [shape: bf16[128,256], index: 4, kind: input, shape index: {}]   ;;  %s4961_s5 = inlined_call_operand.vmem [shape: f32[1,128], index: 5, kind: input, shape index: {}]   ;;  %s4962_s6 = inlined_call_operand.hbm [shape: bf16[128,128], index: 6, kind: input, shape index: {}]   ;;  %s4963_s7 = inlined_call_operand.vmem [shape: f32[1,128], index: 7, kind: input, shape index: {}]   ;;  %s4964_s8 = inlined_call_operand.hbm [shape: bf16[128,128], index: 8, kind: input, shape index: {}]   ;;  %s4965_s9 = inlined_call_operand.vmem [shape: f32[1,128], index: 9, kind: input, shape index: {}]   ;;  %s4966_s10 = inlined_call_operand.hbm [shape: f32[4,128,128], index: 10, kind: output, shape index: {0}]   ;;  %s4967_s11 = inlined_call_operand.hbm [shape: f32[4,128,128], index: 11, kind: output, shape index: {1}]  }
   0x1   :  { %4988 = sst [smem:[#allocation36_spill]] %s4956_s0 }
   0x2   :  { %4989 = sst [smem:[#allocation37_spill]] %s4958_s2 }
   0x3   :  { %4990 = sst [smem:[#allocation38_spill]] %s4960_s4 }
   0x4   :  { %4991 = sst [smem:[#allocation39_spill]] %s4962_s6 }
   0x5   :  { %4992 = sst [smem:[#allocation40_spill]] %s4964_s8 }
   0x6   :  { %17 = vsyncpa [#allocation3], 0 }
   0x7   :  { %19 = vsyncpa [#allocation3 + $0x1], 0 }
   0x8   :  { %20 = vsyncpa [#allocation6], 0 }
   0x9   :  { %22 = vsyncpa [#allocation6 + $0x1], 0 }
   0xa   :  { %23 = vsyncpa [#allocation9], 0 }
   0xb   :  { %24 = vsyncpa [#allocation12], 0 }
   0xc   :  { %25 = vsyncpa [#allocation4], 0 }
   0xd   :  { %27 = vsyncpa [#allocation4 + $0x1], 0 }
   0xe   :  { %28 = vsyncpa [#allocation15], 0 }
   0xf   :  { %30 = vsyncpa [#allocation15 + $0x1], 0  ;;  %s4019_s17 = smov 0   ;;  %s4021_s18 = smov 0  }
  0x10   :  { %s4023_s19 = smov 0   ;;  %s4025_s20 = smov 0  }
  0x11 LB: > { %4993 = sst [smem:[#allocation23_spill]] %s3938_s19  ;;  %s4040_s21 = sadd.s32 4294967295, %s3942_s20   ;;  %s3942_s20 = sphi %s4025_s20, %s5047_s20   ;;  %s3938_s19 = sphi %s4023_s19, %s5049_s19   ;;  %s3934_s18 = sphi %s4021_s18, %s5051_s18   ;;  %s3930_s17 = sphi %s4019_s17, %s5050_s17  }
  0x12   : > { %s2833_s22 = sadd.s32 4294967294, %s3942_s20   ;;  %p56_p0 = scmp.ne.s32.totalorder %s3934_s18, %s3930_s17 }
  0x13   : > { %p4968_p1 = scmp.eq.s32.totalorder %s4040_s21, 0  ;;  %p274_p2 = scmp.eq.s32.totalorder %s4040_s21, 1 }
  0x14   : > { %p280_p3 = scmp.eq.s32.totalorder %s2833_s22, 1  ;;  %p2834_p5 = scmp.ge.s32.totalorder %s3942_s20, 1 }
  0x15   : > { %p4049_p4 = por %p4968_p1, %p56_p0  ;;  %p313_p7 = scmp.lt.s32.totalorder %s3942_s20, 3 }
  0x16   : > { %p4054_p6 = por %p280_p3, %p56_p0  ;;  %s3944_s26 = smov [#allocation7]  }
  0x17   : > { %s4994_s23 = scalar_select %p4049_p4, 1, 0 }
  0x18   : > { %s4995_s24 = scalar_select %p4054_p6, 1, 0 }
  0x19   : > { %p4059_p8 = pnand %p2834_p5, %p313_p7  ;;  %s325_s27 = sshll.u32 %s3944_s26, 4  ;;  %s326_s27 = int_to_ptr.vmem [resolvable:$true] %s325_s27 }
  0x1a   : > { %4996 = sst [smem:[#allocation24_spill]] %s4995_s24  ;;  %s3945_s29 = smov [#allocation8]  }
  0x1b   : > { %p3464_p9 = pneg %p4059_p8  ;;  %s341_s30 = sshll.u32 %s3945_s29, 4  ;;  %s342_s30 = int_to_ptr.vmem [resolvable:$true] %s341_s30 }
  0x1c   : > { %s3946_s12 = smov [#allocation10]   ;;  %s3683_s14 = scalar_lea.vmem %s326_s27, 2048 }
  0x1d   : > { %p4068_p11 = pnand %p3464_p9, %p4968_p1  ;;  %s357_s13 = sshll.u32 %s3946_s12, 4  ;;  %s358_s13 = int_to_ptr.vmem [resolvable:$true] %s357_s13 }
  0x1e   : > { %p3684_p13 = scmp.ne.s32.totalorder %s326_s27, %s3683_s14  ;;  %p3691_p5 = scmp.lt.s32.totalorder %s326_s27, %s326_s27 }
  0x1f   : > { %p3674_p12 = pneg %p4068_p11  ;;  %p3692_p7 = scmp.lt.s32.totalorder %s3683_s14, %s3683_s14 }
  0x21   : > { %p3686_p0 = pnand %p3684_p13, %p3674_p12  ;;  %p3693_p9 = por %p3692_p7, %p3691_p5 }
  0x23   : > { %p3687_p3 = pneg %p3686_p0 }
  0x25   : > { %p3694_p10 = pnand %p3693_p9, %p3687_p3 }
  0x27   : > { %3697 = shalt.err (!%p3694_p10)
}
  0x28   : > { %s4969_s15 = smov 128   ;;  %s4972_s16 = smov 8  }
  0x29   : > { %s4999_s2 = sld [smem:[#allocation37_spill]]  ;;  %s3709_s29 = scalar_lea.vmem %s342_s30, 2048 }
  0x2a   : > { %p3710_p13 = scmp.ne.s32.totalorder %s342_s30, %s3709_s29  ;;  %p3717_p3 = scmp.lt.s32.totalorder %s342_s30, %s342_s30 }
  0x2b   : > { %p3718_p10 = scmp.lt.s32.totalorder %s3709_s29, %s3709_s29 }
  0x2c   : > { %p3712_p0 = pnand %p3710_p13, %p3674_p12 }
  0x2d   : > { %p3719_p7 = por %p3718_p10, %p3717_p3 }
  0x2e   : > { %p3713_p5 = pneg %p3712_p0 }
  0x2f   : > { %3467 = dma.hbm_to_vmem [thread:$0]  (!%p4068_p11), %s4999_s2, 2048, %s326_s27, [#allocation6], %s4969_s15, %s4969_s15, %s4972_s16  }
  0x30   : > { %p3720_p9 = pnand %p3719_p7, %p3713_p5 }
  0x32   : > { %3723 = shalt.err (!%p3720_p9)
}
  0x33   : > { %s5000_s4 = sld [smem:[#allocation38_spill]]  ;;  %s3735_s27 = scalar_lea.vmem %s358_s13, 1024 }
  0x34   : > { %p3736_p1 = scmp.ne.s32.totalorder %s358_s13, %s3735_s27  ;;  %p3743_p3 = scmp.lt.s32.totalorder %s358_s13, %s358_s13 }
  0x35   : > { %p3744_p5 = scmp.lt.s32.totalorder %s3735_s27, %s3735_s27 }
  0x36   : > { %p3738_p13 = pnand %p3736_p1, %p3674_p12 }
  0x37   : > { %p3745_p10 = por %p3744_p5, %p3743_p3 }
  0x38   : > { %p3739_p0 = pneg %p3738_p13 }
  0x39   : > { %3470 = dma.hbm_to_vmem [thread:$0]  (!%p4068_p11), %s5000_s4, 2048, %s342_s30, [#allocation9], %s4969_s15, %s4969_s15, %s4972_s16  }
  0x3a   : > { %p3746_p7 = pnand %p3745_p10, %p3739_p0 }
  0x3c   : > { %3749 = shalt.err (!%p3746_p7)
}
  0x3d   : > { %s4970_s22 = smov 64   ;;  %s4971_s26 = smov 4  }
  0x3e   : > { %s5001_s6 = sld [smem:[#allocation39_spill]]  ;;  %s3951_s12 = smov [#allocation11]  }
  0x3f   : > { %s373_s14 = sshll.u32 %s3951_s12, 4  ;;  %s374_s14 = int_to_ptr.vmem [resolvable:$true] %s373_s14 }
  0x40   : > { %s3761_s15 = scalar_lea.vmem %s374_s14, 1024  ;;  %p3769_p0 = scmp.lt.s32.totalorder %s374_s14, %s374_s14 }
  0x41   : > { %p3762_p1 = scmp.ne.s32.totalorder %s374_s14, %s3761_s15  ;;  %p3770_p3 = scmp.lt.s32.totalorder %s3761_s15, %s3761_s15 }
  0x43   : > { %p3764_p9 = pnand %p3762_p1, %p3674_p12  ;;  %p3771_p5 = por %p3770_p3, %p3769_p0 }
  0x44   : > { %3473 = dma.hbm_to_vmem [thread:$0]  (!%p4068_p11), %s5001_s6, 1024, %s358_s13, [#allocation9], %s4970_s22, %s4970_s22, %s4971_s26  }
  0x45   : > { %p3765_p13 = pneg %p3764_p9 }
  0x47   : > { %p3772_p10 = pnand %p3771_p5, %p3765_p13 }
  0x49   : > { %3775 = shalt.err (!%p3772_p10)
}
  0x4a   : > { %s5002_s8 = sld [smem:[#allocation40_spill]]  ;;  %s4119_s15 = sadd.s32 1, %s3942_s20  }
  0x4b   : > { %5003 = sst [smem:[#allocation25_spill]] %s4119_s15  ;;  %s43_s28 = sadd.s32 1, %s3938_s19 }
  0x4c   : > { %s40_s30 = ssub.s32 %s3942_s20, %s4119_s15  ;;  %p50_p12 = scmp.ne.s32.totalorder %s3938_s19, %s3934_s18 }
  0x4d   : > { %p41_p7 = scmp.eq.s32.totalorder %s40_s30, 0  ;;  %p51_p1 = scmp.eq.s32.totalorder %s3942_s20, 0 }
  0x4e   : > { %p4129_p9 = por %p274_p2, %p50_p12  ;;  %p3495_p13 = scmp.lt.s32.totalorder %s3942_s20, 2 }
  0x4f   : > { %s4135_s12 = scalar_select %p41_p7, %s3938_s19, %s43_s28  }
  0x50   : > { %3476 = dma.hbm_to_vmem [thread:$0]  (!%p4068_p11), %s5002_s8, 1024, %s374_s14, [#allocation12], %s4970_s22, %s4970_s22, %s4971_s26  }
  0x51   : > { %s5004_s29 = scalar_select %p4129_p9, 1, 0 }
  0x52   : > { %5005 = sst [smem:[#allocation26_spill]] %s4135_s12  ;;  %p52_p0 = por %p51_p1, %p50_p12 }
  0x53   : > { %s4138_s13 = sand.u32 1, %s3938_s19   ;;  %s3033_s27 = sshll.u32 %s3942_s20, 12 }
  0x54   : > { %s2840_s14 = sshll.u32 %s4138_s13, 8  ;;  %s5006_s0 = sld [smem:[#allocation36_spill]] }
  0x55   : > { %s394_s16 = scalar_lea.vmem [#allocation2], %s2840_s14  ;;  %p4149_p2 = pnand %p3495_p13, %p52_p0 }
  0x56   : > { %s402_s2 = sshll.u32 %s394_s16, 4  ;;  %s391_s8 = scalar_lea.sflag [#allocation3], %s4138_s13  ;;  %s4147_s2 = int_to_ptr.vmem [resolvable:$true] %s402_s2 }
  0x57   : > { %p3778_p3 = pneg %p4149_p2 }
  0x5a   : > { %s4145_s30 = scalar_lea.hbm %s5006_s0, %s3033_s27  ;;  %s3781_s26 = scalar_lea.hbm %s5006_s0, 8192 }
  0x5b   : > { %s3776_s12 = scalar_lea.hbm %s4145_s30, 4096  ;;  %p3782_p12 = scmp.lt.s32.totalorder %s4145_s30, %s5006_s0 }
  0x5c   : > { %p3777_p11 = scmp.ne.s32.totalorder %s4145_s30, %s3776_s12  ;;  %p3783_p7 = scmp.lt.s32.totalorder %s3781_s26, %s3776_s12 }
  0x5e   : > { %p3779_p5 = pnand %p3778_p3, %p3777_p11  ;;  %p3784_p1 = por %p3783_p7, %p3782_p12 }
  0x60   : > { %p3780_p10 = pneg %p3779_p5 }
  0x62   : > { %p3785_p13 = pnand %p3784_p1, %p3780_p10 }
  0x64   : > { %3788 = shalt.err (!%p3785_p13)
}
  0x65   : > { %s3789_s4 = scalar_lea.vmem %s4147_s2, 4096  ;;  %s3952_s16 = smov [#allocation2]  }
  0x66   : > { %p3790_p0 = scmp.ne.s32.totalorder %s4147_s2, %s3789_s4  ;;  %s3794_s22 = sshll.u32 %s3952_s16, 4  ;;  %s3795_s22 = int_to_ptr.vmem [resolvable:$false] %s3794_s22 }
  0x67   : > { %s3796_s6 = scalar_lea.vmem %s3795_s22, 8192  ;;  %p3797_p6 = scmp.lt.s32.totalorder %s4147_s2, %s3795_s22 }
  0x68   : > { %p3792_p11 = pnand %p3790_p0, %p3778_p3  ;;  %p3798_p9 = scmp.lt.s32.totalorder %s3796_s6, %s3789_s4 }
  0x6a   : > { %p3793_p5 = pneg %p3792_p11  ;;  %p3799_p4 = por %p3798_p9, %p3797_p6 }
  0x6c   : > { %p3800_p12 = pnand %p3799_p4, %p3793_p5 }
  0x6e   : > { %3803 = shalt.err (!%p3800_p12)
}
  0x6f   : > { %s5008_s12 = smov 8   ;;  %s5009_s26 = smov 128  }
  0x70   : > { %3480 = dma.hbm_to_vmem [thread:$0]  (!%p4149_p2), %s4145_s30, 4096, %s4147_s2, %s391_s8, %s5009_s26, %s5009_s26, %s5008_s12  }
  0x71   : > { %s3035_s14 = sshll.u32 %s3942_s20, 11  ;;  %s5010_s16 = sshll.u32 %s4138_s13, 7 }
  0x72   : > { %s4189_s6 = scalar_lea.hbm %s4957_s1, %s3035_s14  ;;  %s416_s22 = scalar_lea.vmem [#allocation5], %s5010_s16 }
  0x73   : > { %s424_s0 = sshll.u32 %s416_s22, 4  ;;  %s5011_s19 = sand.u32 1, %s3942_s20   ;;  %s4193_s0 = int_to_ptr.vmem [resolvable:$true] %s424_s0 }
  0x74   : > { %s413_s15 = scalar_lea.sflag [#allocation6], %s5011_s19  ;;  %s3804_s24 = scalar_lea.hbm %s4189_s6, 2048 }
  0x75   : > { %p3805_p4 = scmp.ne.s32.totalorder %s4189_s6, %s3804_s24  ;;  %s3809_s30 = scalar_lea.hbm %s4957_s1, 4096 }
  0x76   : > { %p3810_p10 = scmp.lt.s32.totalorder %s4189_s6, %s4957_s1  ;;  %p3811_p7 = scmp.lt.s32.totalorder %s3809_s30, %s3804_s24 }
  0x77   : > { %p3807_p6 = pnand %p3805_p4, %p3778_p3 }
  0x78   : > { %p3812_p1 = por %p3811_p7, %p3810_p10 }
  0x79   : > { %p3808_p9 = pneg %p3807_p6 }
  0x7b   : > { %p3813_p13 = pnand %p3812_p1, %p3808_p9 }
  0x7d   : > { %3816 = shalt.err (!%p3813_p13)
}
  0x7e   : > { %s3817_s19 = scalar_lea.vmem %s4193_s0, 2048  ;;  %s3953_s26 = smov [#allocation5]  }
  0x7f   : > { %p3818_p0 = scmp.ne.s32.totalorder %s4193_s0, %s3817_s19  ;;  %s3822_s14 = sshll.u32 %s3953_s26, 4  ;;  %s3823_s14 = int_to_ptr.vmem [resolvable:$false] %s3822_s14 }
  0x80   : > { %s3824_s27 = scalar_lea.vmem %s3823_s14, 4096  ;;  %p3825_p12 = scmp.lt.s32.totalorder %s4193_s0, %s3823_s14 }
  0x81   : > { %p3820_p11 = pnand %p3818_p0, %p3778_p3  ;;  %p3826_p4 = scmp.lt.s32.totalorder %s3824_s27, %s3817_s19 }
  0x83   : > { %p3821_p5 = pneg %p3820_p11  ;;  %p3827_p6 = por %p3826_p4, %p3825_p12 }
  0x85   : > { %p3828_p10 = pnand %p3827_p6, %p3821_p5 }
  0x87   : > { %3831 = shalt.err (!%p3828_p10)
}
  0x88   : > { %s5012_s24 = smov 4   ;;  %s5013_s4 = smov 64  }
  0x89   : > { %3483 = dma.hbm_to_vmem [thread:$0]  (!%p4149_p2), %s4189_s6, 2048, %s4193_s0, %s413_s15, %s5013_s4, %s5013_s4, %s5012_s24  }
  0x8a   : > { %436 = sbr.rel (%p4059_p8) target bundleno = 1723 (0x6bb), region = 60 }
  0x8f   : > { %s4225_s16 = sand.u32 1, %s3934_s18   ;;  %p5014_p3 = scmp.ne.s32.totalorder %s4994_s23, 0 }
  0x90   : > { %s4228_s22 = sshll.u32 %s4225_s16, 8  ;;  %s439_s2 = scalar_lea.sflag [#allocation3], %s4225_s16 }
  0x91   : > { %s4232_s28 = scalar_lea.vmem [#allocation2], %s4228_s22 }
  0x92   : > { %3901 = dma.done.wait (%p5014_p3), %s439_s2, 4096  }
  0x93   : > { %3903 = vsyncadd (%p5014_p3), %s439_s2, 4294963200  ;;  %s447_s0 = sand.u32 1, %s4040_s21   ;;  %s2850_s25 = sshll.u32 %s4225_s16, 7 }
  0x94   : > { %s448_s15 = scalar_lea.sflag [#allocation6], %s447_s0  ;;  %s4240_s6 = scalar_lea.vmem [#allocation5], %s2850_s25 }
  0x95   : > { %3905 = dma.done.wait (%p5014_p3), %s448_s15, 2048  }
  0x96   : > { %3907 = vsyncadd (%p5014_p3), %s448_s15, 4294965248  ;;  %p5015_p8 = scmp.eq.s32.totalorder %s4040_s21, 0 }
  0x98   : > { %3909 = dma.done.wait (%p5015_p8), [#allocation6], 2048   ;;  %p5016_p2 = pmov %p5015_p8 }
  0x9a   : > { %3911 = vsyncadd (%p5016_p2), [#allocation6], 4294965248  ;;  %p5017_p9 = pmov %p5016_p2 }
  0x9b   : > { %p5018_p7 = pmov %p5016_p2 }
  0x9c   : > { %3913 = dma.done.wait (%p5017_p9), [#allocation9], 3072  }
  0x9d   : > { %3915 = vsyncadd (%p5018_p7), [#allocation9], 4294964224  ;;  %p5019_p1 = pmov %p5016_p2 }
  0x9f   : > { %3917 = dma.done.wait (%p5019_p1), [#allocation12], 1024   ;;  %p5020_p13 = pmov %p5019_p1 }
  0xa0   : > { %v3954_v0 = vmov 0   ;;  %v3544_v1 = vld [vmem:[#allocation7 + $0x74] ss:$8 sps:$4 sm:$0xff]   ;;  %v3546_v2 = vld [vmem:[#allocation7 + $0x70] ss:$8 sps:$4 sm:$0xff]   ;;  %v3568_v17 = vld [vmem:[%s4240_s6] sm:$0xff]  }
  0xa1   : > { %3919 = vsyncadd (%p5020_p13), [#allocation12], 4294966272  ;;  %777 = vmatprep.mubr.bf16.mxu0 %v3954_v0  ;;  %745 = vmatprep.subr.bf16.mxu0 %v3544_v1  ;;  %v3547_v3 = vld [vmem:[#allocation7 + $0x64] ss:$8 sps:$4 sm:$0xff]   ;;  %v3549_v4 = vld [vmem:[#allocation7 + $0x60] ss:$8 sps:$4 sm:$0xff]  }
  0xa2   : > { %746 = vmatpush1.bf16.msra.mxu0 %v3546_v2  ;;  %v3550_v5 = vld [vmem:[#allocation7 + $0x54] ss:$8 sps:$4 sm:$0xff]   ;;  %v3552_v6 = vld [vmem:[#allocation7 + $0x50] ss:$8 sps:$4 sm:$0xff]   ;;  %v3553_v7 = vld [vmem:[#allocation7 + $0x44] ss:$8 sps:$4 sm:$0xff]  }
  0xa3   : > { %747 = vmatprep.subr.bf16.mxu0 %v3547_v3  ;;  %v3555_v8 = vld [vmem:[#allocation7 + $0x40] ss:$8 sps:$4 sm:$0xff]   ;;  %v3556_v9 = vld [vmem:[#allocation7 + $0x34] ss:$8 sps:$4 sm:$0xff]   ;;  %v3558_v10 = vld [vmem:[#allocation7 + $0x30] ss:$8 sps:$4 sm:$0xff]  }
  0xa4   : > { %v3559_v11 = vld [vmem:[#allocation7 + $0x24] ss:$8 sps:$4 sm:$0xff]   ;;  %v3561_v12 = vld [vmem:[#allocation7 + $0x20] ss:$8 sps:$4 sm:$0xff]   ;;  %v3562_v13 = vld [vmem:[#allocation7 + $0x14] ss:$8 sps:$4 sm:$0xff]  }
  0xa5   : > { %v3564_v14 = vld [vmem:[#allocation7 + $0x10] ss:$8 sps:$4 sm:$0xff]   ;;  %v3565_v15 = vld [vmem:[#allocation7 + $0x4] ss:$8 sps:$4 sm:$0xff]   ;;  %v3567_v16 = vld [vmem:[#allocation7] ss:$8 sps:$4 sm:$0xff]  }
  0xa6   : > { %748 = vmatpush1.bf16.msra.mxu0 %v3549_v4  ;;  %v3569_v18 = vld [vmem:[%s4240_s6 + $0x8] sm:$0xff]   ;;  %v3570_v19 = vld [vmem:[%s4240_s6 + $0x10] sm:$0xff]   ;;  %v3571_v20 = vld [vmem:[%s4240_s6 + $0x18] sm:$0xff]   ;;  %s4693_s12 = scalar_lea.vmem [#allocation14], %s4228_s22  ;;  %s3037_s14 = sshll.u32 %s4040_s21, 12 }
  0xa7   : > { %749 = vmatprep.subr.bf16.mxu0 %v3550_v5  ;;  %v3572_v21 = vld [vmem:[%s4240_s6 + $0x20] sm:$0xff]   ;;  %v3573_v22 = vld [vmem:[%s4240_s6 + $0x28] sm:$0xff]   ;;  %v3574_v23 = vld [vmem:[%s4240_s6 + $0x30] sm:$0xff]   ;;  %s4801_s4 = scalar_lea.hbm %s4967_s11, %s3037_s14  ;;  %s2667_s2 = sshll.u32 %s4693_s12, 4  ;;  %s4809_s2 = int_to_ptr.vmem [resolvable:$true] %s2667_s2 }
  0xa8   : > { %v3575_v24 = vld [vmem:[%s4240_s6 + $0x38] sm:$0xff]   ;;  %v3576_v25 = vld [vmem:[%s4240_s6 + $0x40] sm:$0xff]   ;;  %v3577_v26 = vld [vmem:[%s4240_s6 + $0x48] sm:$0xff]   ;;  %s2636_s25 = scalar_lea.sflag [#allocation15], %s4225_s16  ;;  %s3832_s15 = scalar_lea.vmem %s4809_s2, 4096 }
  0xa9   : > { %v3578_v27 = vld [vmem:[%s4240_s6 + $0x50] sm:$0xff]   ;;  %v3579_v28 = vld [vmem:[%s4240_s6 + $0x58] sm:$0xff]   ;;  %v3580_v29 = vld [vmem:[%s4240_s6 + $0x60] sm:$0xff]   ;;  %p3833_p0 = scmp.ne.s32.totalorder %s4809_s2, %s3832_s15  ;;  %p5043_p11 = scmp.ne.s32.totalorder %s5004_s29, 0 }
  0xaa   : > { %750 = vmatpush1.bf16.msra.mxu0 %v3552_v6  ;;  %v3581_v30 = vld [vmem:[%s4240_s6 + $0x68] sm:$0xff]   ;;  %v3582_v31 = vld [vmem:[%s4240_s6 + $0x70] sm:$0xff]   ;;  %v3583_v32 = vld [vmem:[%s4240_s6 + $0x78] sm:$0xff]   ;;  %s3955_s6 = smov [#allocation14]  }
  0xab   : > { %751 = vmatprep.subr.bf16.mxu0 %v3553_v7  ;;  %v4292_v33 = vld [vmem:[%s4232_s28 + $0x4] ss:$8 sps:$4 sm:$0xff]   ;;  %p3834_p5 = pnand %p3833_p0, %p5043_p11  ;;  %s3836_s23 = sshll.u32 %s3955_s6, 4  ;;  %s3837_s23 = int_to_ptr.vmem [resolvable:$false] %s3836_s23 }
  0xac   : > { %1105 = vmatprep.mubr.bf16.mxu1 %v4292_v33  ;;  %s3838_s8 = scalar_lea.vmem %s3837_s23, 8192  ;;  %p3839_p4 = scmp.lt.s32.totalorder %s4809_s2, %s3837_s23 }
  0xad   : > { %p3835_p12 = pneg %p3834_p5  ;;  %p3840_p6 = scmp.lt.s32.totalorder %s3838_s8, %s3832_s15 }
  0xae   : > { %752 = vmatpush1.bf16.msra.mxu0 %v3555_v8 }
  0xaf   : > { %753 = vmatprep.subr.bf16.mxu0 %v3556_v9  ;;  %p3841_p10 = por %p3840_p6, %p3839_p4 }
  0xb1   : > { %p3842_p3 = pnand %p3841_p10, %p3835_p12 }
  0xb2   : > { %754 = vmatpush1.bf16.msra.mxu0 %v3558_v10 }
  0xb3   : > { %755 = vmatprep.subr.bf16.mxu0 %v3559_v11 }
  0xb6   : > { %756 = vmatpush1.bf16.msra.mxu0 %v3561_v12 }
  0xb7   : > { %757 = vmatprep.subr.bf16.mxu0 %v3562_v13 }
  0xba   : > { %758 = vmatpush1.bf16.msra.mxu0 %v3564_v14 }
  0xbb   : > { %759 = vmatprep.subr.bf16.mxu0 %v3565_v15 }
  0xbe   : > { %760 = vmatpush1.bf16.msra.mxu0 %v3567_v16 }
  0xc1   : > { %778 = vmatmul.mubr.bf16.vlgmr.msra.gmra.mxu0 %v3568_v17 }
  0xc2   : > { %787 = vmatprep.mubr.bf16.mxu0 %v3954_v0 }
  0xc9   : > { %788 = vmatmul.mubr.bf16.gmra.mxu0 %v3569_v18 }
  0xca   : > { %797 = vmatprep.mubr.bf16.mxu0 %v3954_v0 }
  0xd1   : > { %798 = vmatmul.mubr.bf16.gmra.mxu0 %v3570_v19  ;;  %v3628_v19 = vld [vmem:[#allocation8 + $0x70] ss:$8 sps:$4 sm:$0xff]  }
  0xd2   : > { %807 = vmatprep.mubr.bf16.mxu0 %v3954_v0 }
  0xd9   : > { %808 = vmatmul.mubr.bf16.gmra.mxu0 %v3571_v20  ;;  %v3630_v20 = vld [vmem:[#allocation8 + $0x74] ss:$8 sps:$4 sm:$0xff]  }
  0xda   : > { %817 = vmatprep.mubr.bf16.mxu0 %v3954_v0  ;;  %1508 = vmatprep.subr.bf16.mxu0 %v3630_v20 }
  0xdb   : > { %1509 = vmatpush1.bf16.msra.mxu0 %v3628_v19  ;;  %v4405_v19 = vld [vmem:[%s4232_s28 + $0x54] ss:$8 sps:$4 sm:$0xff]  }
  0xe1   : > { %818 = vmatmul.mubr.bf16.gmra.mxu0 %v3572_v21 }
  0xe2   : > { %827 = vmatprep.mubr.bf16.mxu0 %v3954_v0 }
  0xe9   : > { %828 = vmatmul.mubr.bf16.gmra.mxu0 %v3573_v22 }
  0xea   : > { %837 = vmatprep.mubr.bf16.mxu0 %v3954_v0 }
  0xf1   : > { %838 = vmatmul.mubr.bf16.gmra.mxu0 %v3574_v23 }
  0xf2   : > { %847 = vmatprep.mubr.bf16.mxu0 %v3954_v0 }
  0xf9   : > { %848 = vmatmul.mubr.bf16.gmra.mxu0 %v3575_v24 }
  0xfa   : > { %857 = vmatprep.mubr.bf16.mxu0 %v3954_v0 }
 0x101   : > { %858 = vmatmul.mubr.bf16.gmra.mxu0 %v3576_v25 }
 0x102   : > { %867 = vmatprep.mubr.bf16.mxu0 %v3954_v0 }
 0x109   : > { %868 = vmatmul.mubr.bf16.gmra.mxu0 %v3577_v26 }
 0x10a   : > { %877 = vmatprep.mubr.bf16.mxu0 %v3954_v0 }
 0x111   : > { %878 = vmatmul.mubr.bf16.gmra.mxu0 %v3578_v27 }
 0x112   : > { %887 = vmatprep.mubr.bf16.mxu0 %v3954_v0 }
 0x119   : > { %888 = vmatmul.mubr.bf16.gmra.mxu0 %v3579_v28 }
 0x11a   : > { %897 = vmatprep.mubr.bf16.mxu0 %v3954_v0 }
 0x121   : > { %898 = vmatmul.mubr.bf16.gmra.mxu0 %v3580_v29 }
 0x122   : > { %907 = vmatprep.mubr.bf16.mxu0 %v3954_v0 }
 0x129   : > { %908 = vmatmul.mubr.bf16.gmra.mxu0 %v3581_v30 }
 0x12a   : > { %917 = vmatprep.mubr.bf16.mxu0 %v3954_v0 }
 0x131   : > { %918 = vmatmul.mubr.bf16.gmra.mxu0 %v3582_v31 }
 0x132   : > { %927 = vmatprep.mubr.bf16.mxu0 %v3954_v0 }
 0x139   : > { %928 = vmatmul.mubr.bf16.gmra.mxu0 %v3583_v32 }
 0x13a   : > { %1540 = vmatprep.mubr.bf16.mxu0 %v3954_v0 }
 0x181   : > { %v4295_v34 = vpop.f32.mrf.mxu0 }
 0x183   : > { %v4297_v35 = vpop.f32.mrf.mxu0 }
 0x185   : > { %v4299_v36 = vpop.f32.mrf.mxu0 }
 0x186   : > { %v938_v37 = vpack.c.bf16 %v4299_v36, %v4295_v34  ;;  %v4378_v34 = vld [vmem:[%s4232_s28 + $0x10] ss:$8 sps:$4 sm:$0xff]   ;;  %v3649_v36 = vld [vmem:[#allocation8 + $0x24] ss:$8 sps:$4 sm:$0xff]  }
 0x187   : > { %v4303_v38 = vpop.f32.mrf.mxu0 }
 0x189   : > { %v4305_v39 = vpop.f32.mrf.mxu0 }
 0x18b   : > { %v4307_v40 = vpop.f32.mrf.mxu0 }
 0x18d   : > { %v4309_v41 = vpop.f32.mrf.mxu0 }
 0x18e   : > { %v940_v42 = vpack.c.bf16 %v4309_v41, %v4305_v39  ;;  %v4371_v39 = vld [vmem:[%s4232_s28 + $0x14] ss:$8 sps:$4 sm:$0xff]  }
 0x18f   : > { %v4313_v43 = vpop.f32.mrf.mxu0 }
 0x190   : > { %v941_v32 = vpack.c.bf16 %v4313_v43, %v4307_v40  ;;  %v3640_v40 = vld [vmem:[#allocation8 + $0x54] ss:$8 sps:$4 sm:$0xff]  }
 0x191   : > { %v4315_v44 = vpop.f32.mrf.mxu0 }
 0x193   : > { %v801_v45 = vpop.f32.mrf.mxu0 }
 0x195   : > { %v4317_v46 = vpop.f32.mrf.mxu0 }
 0x196   : > { %v942_v30 = vpack.c.bf16 %v4317_v46, %v4315_v44  ;;  %v3638_v44 = vld [vmem:[#allocation8 + $0x50] ss:$8 sps:$4 sm:$0xff]   ;;  %v4363_v46 = vld [vmem:[%s4232_s28] ss:$8 sps:$4 sm:$0xff]  }
 0x197   : > { %v805_v47 = vpop.f32.mrf.mxu0 }
 0x198   : > { %v943_v28 = vpack.c.bf16 %v805_v47, %v801_v45  ;;  %v939_v45 = vpack.c.bf16 %v4303_v38, %v4297_v35  ;;  %v3635_v47 = vld [vmem:[#allocation8 + $0x60] ss:$8 sps:$4 sm:$0xff]   ;;  %v3643_v35 = vld [vmem:[#allocation8 + $0x44] ss:$8 sps:$4 sm:$0xff]  }
 0x199   : > { %v809_v48 = vpop.f32.mrf.mxu0 }
 0x19b   : > { %v811_v49 = vpop.f32.mrf.mxu0 }
 0x19d   : > { %v813_v50 = vpop.f32.mrf.mxu0 }
 0x19e   : > { %v944_v26 = vpack.c.bf16 %v813_v50, %v809_v48  ;;  %v3637_v50 = vld [vmem:[#allocation8 + $0x64] ss:$8 sps:$4 sm:$0xff]  }
 0x19f   : > { %v815_v51 = vpop.f32.mrf.mxu0  ;;  %1510 = vmatprep.subr.bf16.mxu0 %v3637_v50 }
 0x1a0   : > { %v945_v23 = vpack.c.bf16 %v815_v51, %v811_v49  ;;  %1511 = vmatpush1.bf16.msra.mxu0 %v3635_v47 }
 0x1a1   : > { %v819_v52 = vpop.f32.mrf.mxu0  ;;  %1512 = vmatprep.subr.bf16.mxu0 %v3640_v40 }
 0x1a3   : > { %v821_v53 = vpop.f32.mrf.mxu0 }
 0x1a4   : > { %1513 = vmatpush1.bf16.msra.mxu0 %v3638_v44  ;;  %v4421_v44 = vld [vmem:[%s4232_s28 + $0x60] ss:$8 sps:$4 sm:$0xff]  }
 0x1a5   : > { %v823_v54 = vpop.f32.mrf.mxu0  ;;  %1514 = vmatprep.subr.bf16.mxu0 %v3643_v35  ;;  %v4424_v35 = vld [vmem:[%s4232_s28 + $0x74] ss:$8 sps:$4 sm:$0xff]  }
 0x1a6   : > { %v946_v21 = vpack.c.bf16 %v823_v54, %v819_v52  ;;  %v3646_v52 = vld [vmem:[#allocation8 + $0x34] ss:$8 sps:$4 sm:$0xff]  }
 0x1a7   : > { %v825_v55 = vpop.f32.mrf.mxu0 }
 0x1a8   : > { %v947_v17 = vpack.c.bf16 %v825_v55, %v821_v53  ;;  %v3644_v55 = vld [vmem:[#allocation8 + $0x30] ss:$8 sps:$4 sm:$0xff]  }
 0x1a9   : > { %v829_v56 = vpop.f32.mrf.mxu0 }
 0x1ab   : > { %v831_v57 = vpop.f32.mrf.mxu0 }
 0x1ad   : > { %v833_v58 = vpop.f32.mrf.mxu0 }
 0x1ae   : > { %v948_v15 = vpack.c.bf16 %v833_v58, %v829_v56  ;;  %v4381_v56 = vld [vmem:[%s4232_s28 + $0x24] ss:$8 sps:$4 sm:$0xff]   ;;  %v3647_v58 = vld [vmem:[#allocation8 + $0x20] ss:$8 sps:$4 sm:$0xff]  }
 0x1af   : > { %v835_v59 = vpop.f32.mrf.mxu0 }
 0x1b0   : > { %v949_v12 = vpack.c.bf16 %v835_v59, %v831_v57 }
 0x1b1   : > { %v839_v60 = vpop.f32.mrf.mxu0 }
 0x1b3   : > { %v841_v61 = vpop.f32.mrf.mxu0 }
 0x1b5   : > { %v843_v62 = vpop.f32.mrf.mxu0 }
 0x1b6   : > { %v950_v10 = vpack.c.bf16 %v843_v62, %v839_v60 }
 0x1b7   : > { %v845_v63 = vpop.f32.mrf.mxu0 }
 0x1b8   : > { %v951_v8 = vpack.c.bf16 %v845_v63, %v841_v61  ;;  %v4386_v61 = vld [vmem:[%s4232_s28 + $0x20] ss:$8 sps:$4 sm:$0xff]   ;;  %v4389_v63 = vld [vmem:[%s4232_s28 + $0x34] ss:$8 sps:$4 sm:$0xff]  }
 0x1b9   : > { %v849_v1 = vpop.f32.mrf.mxu0 }
 0x1bb   : > { %v851_v2 = vpop.f32.mrf.mxu0 }
 0x1bd   : > { %v853_v3 = vpop.f32.mrf.mxu0 }
 0x1be   : > { %v952_v6 = vpack.c.bf16 %v853_v3, %v849_v1 }
 0x1bf   : > { %v855_v4 = vpop.f32.mrf.mxu0 }
 0x1c0   : > { %v953_v5 = vpack.c.bf16 %v855_v4, %v851_v2  ;;  %v4394_v4 = vld [vmem:[%s4232_s28 + $0x30] ss:$8 sps:$4 sm:$0xff]  }
 0x1c1   : > { %v4319_v7 = vpop.f32.mrf.mxu0 }
 0x1c2   : > { %3040 = vmatprep.subr.bf16.mxu1 %v953_v5 }
 0x1c3   : > { %v4321_v9 = vpop.f32.mrf.mxu0  ;;  %3041 = vmatpush3.bf16.msra.mxu1 %v952_v6  ;;  %v4397_v6 = vld [vmem:[%s4232_s28 + $0x44] ss:$8 sps:$4 sm:$0xff]  }
 0x1c4   : > { %3042 = vmatprep.subr.bf16.mxu1 %v951_v8 }
 0x1c5   : > { %v4323_v11 = vpop.f32.mrf.mxu0 }
 0x1c6   : > { %v954_v13 = vpack.c.bf16 %v4323_v11, %v4319_v7  ;;  %v3655_v7 = vld [vmem:[#allocation8 + $0x4] ss:$8 sps:$4 sm:$0xff]   ;;  %v3653_v11 = vld [vmem:[#allocation8] ss:$8 sps:$4 sm:$0xff]  }
 0x1c7   : > { %v4327_v14 = vpop.f32.mrf.mxu0  ;;  %3043 = vmatpush3.bf16.msra.mxu1 %v950_v10 }
 0x1c8   : > { %3044 = vmatprep.subr.bf16.mxu1 %v949_v12 }
 0x1c9   : > { %v4329_v16 = vpop.f32.mrf.mxu0 }
 0x1cb   : > { %v4331_v18 = vpop.f32.mrf.mxu0  ;;  %3045 = vmatpush3.bf16.msra.mxu1 %v948_v15  ;;  %v4402_v15 = vld [vmem:[%s4232_s28 + $0x40] ss:$8 sps:$4 sm:$0xff]  }
 0x1cc   : > { %3046 = vmatprep.subr.bf16.mxu1 %v947_v17 }
 0x1cd   : > { %v4333_v22 = vpop.f32.mrf.mxu0 }
 0x1ce   : > { %v956_v24 = vpack.c.bf16 %v4333_v22, %v4329_v16  ;;  %v3652_v16 = vld [vmem:[#allocation8 + $0x14] ss:$8 sps:$4 sm:$0xff]   ;;  %v3650_v22 = vld [vmem:[#allocation8 + $0x10] ss:$8 sps:$4 sm:$0xff]  }
 0x1cf   : > { %v4337_v25 = vpop.f32.mrf.mxu0  ;;  %3047 = vmatpush3.bf16.msra.mxu1 %v946_v21 }
 0x1d0   : > { %3048 = vmatprep.subr.bf16.mxu1 %v945_v23 }
 0x1d1   : > { %v4339_v27 = vpop.f32.mrf.mxu0 }
 0x1d3   : > { %v4341_v29 = vpop.f32.mrf.mxu0  ;;  %3049 = vmatpush3.bf16.msra.mxu1 %v944_v26 }
 0x1d4   : > { %3050 = vmatprep.subr.bf16.mxu1 %v943_v28 }
 0x1d5   : > { %v4345_v31 = vpop.f32.mrf.mxu0 }
 0x1d7   : > { %v4349_v49 = vpop.f32.mrf.mxu0  ;;  %3051 = vmatpush3.bf16.msra.mxu1 %v942_v30  ;;  %v4410_v30 = vld [vmem:[%s4232_s28 + $0x50] ss:$8 sps:$4 sm:$0xff]  }
 0x1d8   : > { %3052 = vmatprep.subr.bf16.mxu1 %v941_v32  ;;  %v4413_v32 = vld [vmem:[%s4232_s28 + $0x64] ss:$8 sps:$4 sm:$0xff]  }
 0x1d9   : > { %v4351_v48 = vpop.f32.mrf.mxu0 }
 0x1db   : > { %v4355_v51 = vpop.f32.mrf.mxu0  ;;  %3053 = vmatpush3.bf16.msra.mxu1 %v940_v42  ;;  %v3641_v42 = vld [vmem:[#allocation8 + $0x40] ss:$8 sps:$4 sm:$0xff]  }
 0x1dc   : > { %3054 = vmatprep.subr.bf16.mxu1 %v939_v45  ;;  %1515 = vmatpush1.bf16.msra.mxu0 %v3641_v42 }
 0x1dd   : > { %v4360_v43 = vpop.f32.mrf.mxu0  ;;  %1516 = vmatprep.subr.bf16.mxu0 %v3646_v52  ;;  %v959_v52 = vpack.c.bf16 %v4349_v49, %v4341_v29  ;;  %v4440_v29 = vld [vmem:[%s4232_s28 + $0x84] ss:$8 sps:$4 sm:$0xff]   ;;  %v955_v49 = vpack.c.bf16 %v4327_v14, %v4321_v9  ;;  %v4461_v9 = vld [vmem:[%s4232_s28 + $0x90] ss:$8 sps:$4 sm:$0xff]  }
 0x1de   : > { %v960_v42 = vpack.c.bf16 %v4360_v43, %v4351_v48  ;;  %v4437_v48 = vld [vmem:[%s4232_s28 + $0x70] ss:$8 sps:$4 sm:$0xff]   ;;  %v4464_v14 = vld [vmem:[%s4232_s28 + $0xa4] ss:$8 sps:$4 sm:$0xff]   ;;  %v4485_v43 = vld [vmem:[%s4232_s28 + $0xc0] ss:$8 sps:$4 sm:$0xff]  }
 0x1df   : > { %v4365_v38 = vpop.f32.mrf.mxu0  ;;  %3055 = vmatpush3.bf16.msra.mxu1 %v938_v37  ;;  %5023 = vst [vmem:[#allocation29_spill] sm:$0xff] %v4485_v43 }
 0x1e0   : > { %1517 = vmatpush1.bf16.msra.mxu0 %v3644_v55  ;;  %v961_v40 = vpack.c.bf16 %v4365_v38, %v4355_v51  ;;  %v958_v51 = vpack.c.bf16 %v4345_v31, %v4339_v27  ;;  %v957_v38 = vpack.c.bf16 %v4337_v25, %v4331_v18  ;;  %v4450_v18 = vld [vmem:[%s4232_s28 + $0x80] ss:$8 sps:$4 sm:$0xff]   ;;  %v4456_v25 = vld [vmem:[%s4232_s28 + $0x94] ss:$8 sps:$4 sm:$0xff]   ;;  %v4477_v27 = vld [vmem:[%s4232_s28 + $0xb0] ss:$8 sps:$4 sm:$0xff]  }
 0x1e1   : > { %v4373_v41 = vpop.f32.mrf.mxu0  ;;  %1518 = vmatprep.subr.bf16.mxu0 %v3649_v36  ;;  %5021 = vst [vmem:[#allocation27_spill] sm:$0xff] %v4477_v27  ;;  %v4480_v31 = vld [vmem:[%s4232_s28 + $0xc4] ss:$8 sps:$4 sm:$0xff]   ;;  %v4501_v55 = vld [vmem:[%s4232_s28 + $0xe0] ss:$8 sps:$4 sm:$0xff]  }
 0x1e2   : > { %1106 = vmatmul.mubr.bf16.vlgmr.msra.gmra.mxu1 %v4363_v46  ;;  %5022 = vst [vmem:[#allocation28_spill] sm:$0xff] %v4480_v31  ;;  %5027 = vst [vmem:[#allocation33_spill] sm:$0xff] %v4501_v55  ;;  %v4504_v36 = vld [vmem:[%s4232_s28 + $0xf4] ss:$8 sps:$4 sm:$0xff]  }
 0x1e3   : > { %v901_v53 = vpop.f32.mrf.mxu0  ;;  %1113 = vmatprep.mubr.bf16.mxu1 %v4371_v39  ;;  %5028 = vst [vmem:[#allocation34_spill] sm:$0xff] %v4504_v36 }
 0x1e4   : > { %1519 = vmatpush1.bf16.msra.mxu0 %v3647_v58 }
 0x1e5   : > { %v903_v54 = vpop.f32.mrf.mxu0  ;;  %1520 = vmatprep.subr.bf16.mxu0 %v3652_v16 }
 0x1e6   : > { %v962_v50 = vpack.c.bf16 %v903_v54, %v4373_v41  ;;  %v4488_v41 = vld [vmem:[%s4232_s28 + $0xd4] ss:$8 sps:$4 sm:$0xff]   ;;  %v4496_v54 = vld [vmem:[%s4232_s28 + $0xe4] ss:$8 sps:$4 sm:$0xff]  }
 0x1e7   : > { %v905_v37 = vpop.f32.mrf.mxu0  ;;  %5024 = vst [vmem:[#allocation30_spill] sm:$0xff] %v4488_v41  ;;  %5026 = vst [vmem:[#allocation32_spill] sm:$0xff] %v4496_v54 }
 0x1e8   : > { %v963_v47 = vpack.c.bf16 %v905_v37, %v901_v53  ;;  %1521 = vmatpush1.bf16.msra.mxu0 %v3650_v22  ;;  %v4493_v53 = vld [vmem:[%s4232_s28 + $0xd0] ss:$8 sps:$4 sm:$0xff]  }
 0x1e9   : > { %v909_v57 = vpop.f32.mrf.mxu0  ;;  %1522 = vmatprep.subr.bf16.mxu0 %v3655_v7  ;;  %5025 = vst [vmem:[#allocation31_spill] sm:$0xff] %v4493_v53  ;;  %v4509_v37 = vld [vmem:[%s4232_s28 + $0xf0] ss:$8 sps:$4 sm:$0xff]  }
 0x1ea   : > { %1114 = vmatmul.mubr.bf16.gmra.mxu1 %v4378_v34  ;;  %5029 = vst [vmem:[#allocation35_spill] sm:$0xff] %v4509_v37 }
 0x1eb   : > { %v911_v59 = vpop.f32.mrf.mxu0  ;;  %1121 = vmatprep.mubr.bf16.mxu1 %v4381_v56 }
 0x1ec   : > { %1523 = vmatpush1.bf16.msra.mxu0 %v3653_v11 }
 0x1ed   : > { %v913_v60 = vpop.f32.mrf.mxu0 }
 0x1ee   : > { %v964_v45 = vpack.c.bf16 %v913_v60, %v909_v57  ;;  %v4516_v60 = vld [vmem:[%s4959_s3] ss:$0 sm:$0xff] }
 0x1ef   : > { %v915_v62 = vpop.f32.mrf.mxu0 }
 0x1f0   : > { %v965_v28 = vpack.c.bf16 %v915_v62, %v911_v59 }
 0x1f1   : > { %v919_v1 = vpop.f32.mrf.mxu0 }
 0x1f2   : > { %1122 = vmatmul.mubr.bf16.gmra.mxu1 %v4386_v61 }
 0x1f3   : > { %v921_v2 = vpop.f32.mrf.mxu0  ;;  %1129 = vmatprep.mubr.bf16.mxu1 %v4389_v63 }
 0x1f5   : > { %v923_v3 = vpop.f32.mrf.mxu0 }
 0x1f6   : > { %v966_v26 = vpack.c.bf16 %v923_v3, %v919_v1 }
 0x1f7   : > { %v925_v5 = vpop.f32.mrf.mxu0 }
 0x1f8   : > { %v967_v23 = vpack.c.bf16 %v925_v5, %v921_v2 }
 0x1f9   : > { %v929_v8 = vpop.f32.mrf.mxu0 }
 0x1fa   : > { %1130 = vmatmul.mubr.bf16.gmra.mxu1 %v4394_v4 }
 0x1fb   : > { %v931_v10 = vpop.f32.mrf.mxu0  ;;  %1137 = vmatprep.mubr.bf16.mxu1 %v4397_v6 }
 0x1fd   : > { %v933_v12 = vpop.f32.mrf.mxu0 }
 0x1fe   : > { %v968_v21 = vpack.c.bf16 %v933_v12, %v929_v8 }
 0x1ff   : > { %v935_v17 = vpop.f32.mrf.mxu0 }
 0x200   : > { %v969_v20 = vpack.c.bf16 %v935_v17, %v931_v10 }
 0x202   : > { %1138 = vmatmul.mubr.bf16.gmra.mxu1 %v4402_v15  ;;  %3104 = vmatprep.subr.bf16.mxu1 %v969_v20 }
 0x203   : > { %3105 = vmatpush3.bf16.msra.mxu1 %v968_v21  ;;  %1145 = vmatprep.mubr.bf16.mxu1 %v4405_v19 }
 0x204   : > { %3106 = vmatprep.subr.bf16.mxu1 %v967_v23 }
 0x207   : > { %3107 = vmatpush3.bf16.msra.mxu1 %v966_v26 }
 0x208   : > { %3108 = vmatprep.subr.bf16.mxu1 %v965_v28 }
 0x20a   : > { %1146 = vmatmul.mubr.bf16.gmra.mxu1 %v4410_v30 }
 0x20b   : > { %3109 = vmatpush3.bf16.msra.mxu1 %v964_v45  ;;  %1153 = vmatprep.mubr.bf16.mxu1 %v4413_v32 }
 0x20c   : > { %3110 = vmatprep.subr.bf16.mxu1 %v963_v47 }
 0x20f   : > { %3111 = vmatpush3.bf16.msra.mxu1 %v962_v50 }
 0x210   : > { %3112 = vmatprep.subr.bf16.mxu1 %v961_v40 }
 0x212   : > { %1154 = vmatmul.mubr.bf16.gmra.mxu1 %v4421_v44 }
 0x213   : > { %3113 = vmatpush3.bf16.msra.mxu1 %v960_v42  ;;  %1161 = vmatprep.mubr.bf16.mxu1 %v4424_v35 }
 0x214   : > { %3114 = vmatprep.subr.bf16.mxu1 %v959_v52 }
 0x217   : > { %3115 = vmatpush3.bf16.msra.mxu1 %v958_v51 }
 0x218   : > { %3116 = vmatprep.subr.bf16.mxu1 %v957_v38 }
 0x21a   : > { %1162 = vmatmul.mubr.bf16.gmra.mxu1 %v4437_v48 }
 0x21b   : > { %3117 = vmatpush3.bf16.msra.mxu1 %v956_v24  ;;  %1315 = vmatprep.mubr.bf16.mxu1 %v4440_v29  ;;  %v4472_v24 = vld [vmem:[%s4232_s28 + $0xb4] ss:$8 sps:$4 sm:$0xff]  }
 0x21c   : > { %3118 = vmatprep.subr.bf16.mxu1 %v955_v49 }
 0x21f   : > { %3119 = vmatpush3.bf16.msra.mxu1 %v954_v13  ;;  %v4469_v13 = vld [vmem:[%s4232_s28 + $0xa0] ss:$8 sps:$4 sm:$0xff]  }
 0x222   : > { %1316 = vmatmul.mubr.bf16.vlgmr.msra.gmra.mxu1 %v4450_v18 }
 0x223   : > { %1323 = vmatprep.mubr.bf16.mxu1 %v4456_v25 }
 0x22a   : > { %1324 = vmatmul.mubr.bf16.gmra.mxu1 %v4461_v9 }
 0x22b   : > { %1331 = vmatprep.mubr.bf16.mxu1 %v4464_v14 }
 0x232   : > { %1332 = vmatmul.mubr.bf16.gmra.mxu1 %v4469_v13 }
 0x233   : > { %1339 = vmatprep.mubr.bf16.mxu1 %v4472_v24 }
 0x23a   : > { %1340 = vmatmul.mubr.bf16.gmra.mxu1 %v4477_v27 }
 0x23b   : > { %1347 = vmatprep.mubr.bf16.mxu1 %v4480_v31 }
 0x242   : > { %1348 = vmatmul.mubr.bf16.gmra.mxu1 %v4485_v43 }
 0x243   : > { %1355 = vmatprep.mubr.bf16.mxu1 %v4488_v41 }
 0x24a   : > { %1356 = vmatmul.mubr.bf16.gmra.mxu1 %v4493_v53 }
 0x24b   : > { %1363 = vmatprep.mubr.bf16.mxu1 %v4496_v54 }
 0x252   : > { %1364 = vmatmul.mubr.bf16.gmra.mxu1 %v4501_v55 }
 0x253   : > { %1371 = vmatprep.mubr.bf16.mxu1 %v4504_v36 }
 0x25a   : > { %1372 = vmatmul.mubr.bf16.gmra.mxu1 %v4509_v37 }
 0x25b   : > { %1772 = vmatprep.mubr.bf16.mxu1 %v4292_v33 }
 0x2a2   : > { %v3056_v57 = vpop.f32.mrf.mxu1 }
 0x2a4   : > { %v3057_v58 = vpop.f32.mrf.mxu1 }
 0x2a5   : > { %v3058_v59 = vadd.f32 %v3057_v58, %v3056_v57 }
 0x2a6   : > { %v3059_v62 = vpop.f32.mrf.mxu1 }
 0x2a7   : > { %v1108_v2 = vadd.f32 %v3058_v59, %v4516_v60 }
 0x2a8   : > { %v3060_v1 = vpop.f32.mrf.mxu1 }
 0x2a9   : > { %v3061_v3 = vadd.f32 %v3060_v1, %v3059_v62  ;;  %v1170_v12 = vmax.f32 %v1108_v2, 0.0 }
 0x2aa   : > { %v3062_v5 = vpop.f32.mrf.mxu1 }
 0x2ab   : > { %v1111_v8 = vadd.f32 %v3061_v3, %v4516_v60 }
 0x2ac   : > { %v3063_v10 = vpop.f32.mrf.mxu1 }
 0x2ad   : > { %v1171_v17 = vmax.f32 %v1111_v8, 0.0  ;;  %v3064_v33 = vadd.f32 %v3063_v10, %v3062_v5 }
 0x2ae   : > { %v3065_v20 = vpop.f32.mrf.mxu1 }
 0x2af   : > { %v1396_v21 = vpack.c.bf16 %v1171_v17, %v1170_v12  ;;  %v1116_v26 = vadd.f32 %v3064_v33, %v4516_v60 }
 0x2b0   : > { %v3066_v23 = vpop.f32.mrf.mxu1 }
 0x2b1   : > { %v3067_v28 = vadd.f32 %v3066_v23, %v3065_v20  ;;  %1541 = vmatmul.mubr.bf16.vlgmr.msra.gmra.mxu0 %v1396_v21  ;;  %v1172_v40 = vmax.f32 %v1116_v26, 0.0 }
 0x2b2   : > { %v3068_v45 = vpop.f32.mrf.mxu1  ;;  %1550 = vmatprep.mubr.bf16.mxu0 %v3954_v0 }
 0x2b3   : > { %v1119_v47 = vadd.f32 %v3067_v28, %v4516_v60 }
 0x2b4   : > { %v3069_v50 = vpop.f32.mrf.mxu1 }
 0x2b5   : > { %v1173_v42 = vmax.f32 %v1119_v47, 0.0  ;;  %v3070_v52 = vadd.f32 %v3069_v50, %v3068_v45 }
 0x2b6   : > { %v3071_v51 = vpop.f32.mrf.mxu1 }
 0x2b7   : > { %v1397_v38 = vpack.c.bf16 %v1173_v42, %v1172_v40  ;;  %v1124_v16 = vadd.f32 %v3070_v52, %v4516_v60 }
 0x2b8   : > { %v3072_v49 = vpop.f32.mrf.mxu1 }
 0x2b9   : > { %v3073_v22 = vadd.f32 %v3072_v49, %v3071_v51  ;;  %1551 = vmatmul.mubr.bf16.gmra.mxu0 %v1397_v38  ;;  %v1174_v58 = vmax.f32 %v1124_v16, 0.0 }
 0x2ba   : > { %v3074_v7 = vpop.f32.mrf.mxu1  ;;  %1560 = vmatprep.mubr.bf16.mxu0 %v3954_v0 }
 0x2bb   : > { %v1127_v11 = vadd.f32 %v3073_v22, %v4516_v60 }
 0x2bc   : > { %v3075_v57 = vpop.f32.mrf.mxu1 }
 0x2bd   : > { %v1175_v59 = vmax.f32 %v1127_v11, 0.0  ;;  %v3076_v62 = vadd.f32 %v3075_v57, %v3074_v7 }
 0x2be   : > { %v3077_v1 = vpop.f32.mrf.mxu1 }
 0x2bf   : > { %v1398_v2 = vpack.c.bf16 %v1175_v59, %v1174_v58  ;;  %v1132_v5 = vadd.f32 %v3076_v62, %v4516_v60 }
 0x2c0   : > { %v3078_v3 = vpop.f32.mrf.mxu1 }
 0x2c1   : > { %v3079_v8 = vadd.f32 %v3078_v3, %v3077_v1  ;;  %1561 = vmatmul.mubr.bf16.gmra.mxu0 %v1398_v2  ;;  %v1176_v33 = vmax.f32 %v1132_v5, 0.0 }
 0x2c2   : > { %v3080_v10 = vpop.f32.mrf.mxu1  ;;  %1570 = vmatprep.mubr.bf16.mxu0 %v3954_v0 }
 0x2c3   : > { %v1135_v12 = vadd.f32 %v3079_v8, %v4516_v60 }
 0x2c4   : > { %v3081_v17 = vpop.f32.mrf.mxu1 }
 0x2c5   : > { %v1177_v20 = vmax.f32 %v1135_v12, 0.0  ;;  %v3082_v21 = vadd.f32 %v3081_v17, %v3080_v10 }
 0x2c6   : > { %v3083_v23 = vpop.f32.mrf.mxu1 }
 0x2c7   : > { %v1399_v26 = vpack.c.bf16 %v1177_v20, %v1176_v33  ;;  %v1140_v45 = vadd.f32 %v3082_v21, %v4516_v60 }
 0x2c8   : > { %v3084_v28 = vpop.f32.mrf.mxu1 }
 0x2c9   : > { %v3085_v47 = vadd.f32 %v3084_v28, %v3083_v23  ;;  %1571 = vmatmul.mubr.bf16.gmra.mxu0 %v1399_v26  ;;  %v1178_v52 = vmax.f32 %v1140_v45, 0.0 }
 0x2ca   : > { %v3086_v50 = vpop.f32.mrf.mxu1  ;;  %1580 = vmatprep.mubr.bf16.mxu0 %v3954_v0 }
 0x2cb   : > { %v1143_v40 = vadd.f32 %v3085_v47, %v4516_v60 }
 0x2cc   : > { %v3087_v42 = vpop.f32.mrf.mxu1 }
 0x2cd   : > { %v1179_v51 = vmax.f32 %v1143_v40, 0.0  ;;  %v3088_v38 = vadd.f32 %v3087_v42, %v3086_v50 }
 0x2ce   : > { %v3089_v49 = vpop.f32.mrf.mxu1 }
 0x2cf   : > { %v1400_v16 = vpack.c.bf16 %v1179_v51, %v1178_v52  ;;  %v1148_v7 = vadd.f32 %v3088_v38, %v4516_v60 }
 0x2d0   : > { %v3090_v22 = vpop.f32.mrf.mxu1 }
 0x2d1   : > { %v3091_v11 = vadd.f32 %v3090_v22, %v3089_v49  ;;  %1581 = vmatmul.mubr.bf16.gmra.mxu0 %v1400_v16  ;;  %v1180_v62 = vmax.f32 %v1148_v7, 0.0 }
 0x2d2   : > { %v3092_v57 = vpop.f32.mrf.mxu1  ;;  %1590 = vmatprep.mubr.bf16.mxu0 %v3954_v0 }
 0x2d3   : > { %v1151_v58 = vadd.f32 %v3091_v11, %v4516_v60 }
 0x2d4   : > { %v3093_v59 = vpop.f32.mrf.mxu1 }
 0x2d5   : > { %v1181_v1 = vmax.f32 %v1151_v58, 0.0  ;;  %v3094_v2 = vadd.f32 %v3093_v59, %v3092_v57 }
 0x2d6   : > { %v3095_v3 = vpop.f32.mrf.mxu1 }
 0x2d7   : > { %v1401_v5 = vpack.c.bf16 %v1181_v1, %v1180_v62  ;;  %v1156_v10 = vadd.f32 %v3094_v2, %v4516_v60 }
 0x2d8   : > { %v3096_v8 = vpop.f32.mrf.mxu1 }
 0x2d9   : > { %v3097_v12 = vadd.f32 %v3096_v8, %v3095_v3  ;;  %1591 = vmatmul.mubr.bf16.gmra.mxu0 %v1401_v5  ;;  %v1182_v21 = vmax.f32 %v1156_v10, 0.0 }
 0x2da   : > { %v3098_v17 = vpop.f32.mrf.mxu1  ;;  %1600 = vmatprep.mubr.bf16.mxu0 %v3954_v0 }
 0x2db   : > { %v1159_v33 = vadd.f32 %v3097_v12, %v4516_v60 }
 0x2dc   : > { %v3099_v20 = vpop.f32.mrf.mxu1 }
 0x2dd   : > { %v1183_v23 = vmax.f32 %v1159_v33, 0.0  ;;  %v3100_v26 = vadd.f32 %v3099_v20, %v3098_v17 }
 0x2de   : > { %v3101_v28 = vpop.f32.mrf.mxu1 }
 0x2df   : > { %v1402_v45 = vpack.c.bf16 %v1183_v23, %v1182_v21  ;;  %v1164_v50 = vadd.f32 %v3100_v26, %v4516_v60 }
 0x2e0   : > { %v3102_v47 = vpop.f32.mrf.mxu1 }
 0x2e1   : > { %v3103_v40 = vadd.f32 %v3102_v47, %v3101_v28  ;;  %1601 = vmatmul.mubr.bf16.gmra.mxu0 %v1402_v45  ;;  %v1184_v38 = vmax.f32 %v1164_v50, 0.0 }
 0x2e2   : > { %v3120_v42 = vpop.f32.mrf.mxu1  ;;  %1610 = vmatprep.mubr.bf16.mxu0 %v3954_v0 }
 0x2e3   : > { %v1167_v52 = vadd.f32 %v3103_v40, %v4516_v60 }
 0x2e4   : > { %v3121_v51 = vpop.f32.mrf.mxu1 }
 0x2e5   : > { %v1185_v49 = vmax.f32 %v1167_v52, 0.0  ;;  %v3122_v16 = vadd.f32 %v3121_v51, %v3120_v42 }
 0x2e6   : > { %v3123_v22 = vpop.f32.mrf.mxu1 }
 0x2e7   : > { %v1403_v7 = vpack.c.bf16 %v1185_v49, %v1184_v38  ;;  %v1318_v57 = vadd.f32 %v3122_v16, %v4516_v60 }
 0x2e8   : > { %v3124_v11 = vpop.f32.mrf.mxu1 }
 0x2e9   : > { %v3125_v58 = vadd.f32 %v3124_v11, %v3123_v22  ;;  %1611 = vmatmul.mubr.bf16.gmra.mxu0 %v1403_v7  ;;  %v1380_v2 = vmax.f32 %v1318_v57, 0.0 }
 0x2ea   : > { %v3126_v59 = vpop.f32.mrf.mxu1  ;;  %1620 = vmatprep.mubr.bf16.mxu0 %v3954_v0 }
 0x2eb   : > { %v1321_v62 = vadd.f32 %v3125_v58, %v4516_v60 }
 0x2ec   : > { %v3127_v1 = vpop.f32.mrf.mxu1 }
 0x2ed   : > { %v1381_v3 = vmax.f32 %v1321_v62, 0.0  ;;  %v3128_v5 = vadd.f32 %v3127_v1, %v3126_v59 }
 0x2ee   : > { %v3129_v8 = vpop.f32.mrf.mxu1 }
 0x2ef   : > { %v1404_v10 = vpack.c.bf16 %v1381_v3, %v1380_v2  ;;  %v1326_v17 = vadd.f32 %v3128_v5, %v4516_v60 }
 0x2f0   : > { %v3130_v12 = vpop.f32.mrf.mxu1 }
 0x2f1   : > { %v3131_v33 = vadd.f32 %v3130_v12, %v3129_v8  ;;  %1621 = vmatmul.mubr.bf16.gmra.mxu0 %v1404_v10  ;;  %v1382_v26 = vmax.f32 %v1326_v17, 0.0 }
 0x2f2   : > { %v3132_v20 = vpop.f32.mrf.mxu1  ;;  %1630 = vmatprep.mubr.bf16.mxu0 %v3954_v0 }
 0x2f3   : > { %v1329_v21 = vadd.f32 %v3131_v33, %v4516_v60 }
 0x2f4   : > { %v3133_v23 = vpop.f32.mrf.mxu1 }
 0x2f5   : > { %v1383_v28 = vmax.f32 %v1329_v21, 0.0  ;;  %v3134_v45 = vadd.f32 %v3133_v23, %v3132_v20 }
 0x2f6   : > { %v3135_v47 = vpop.f32.mrf.mxu1 }
 0x2f7   : > { %v1405_v50 = vpack.c.bf16 %v1383_v28, %v1382_v26  ;;  %v1334_v42 = vadd.f32 %v3134_v45, %v4516_v60 }
 0x2f8   : > { %v3136_v40 = vpop.f32.mrf.mxu1 }
 0x2f9   : > { %v3137_v52 = vadd.f32 %v3136_v40, %v3135_v47  ;;  %1631 = vmatmul.mubr.bf16.gmra.mxu0 %v1405_v50  ;;  %v1384_v16 = vmax.f32 %v1334_v42, 0.0 }
 0x2fa   : > { %v3138_v51 = vpop.f32.mrf.mxu1  ;;  %1640 = vmatprep.mubr.bf16.mxu0 %v3954_v0 }
 0x2fb   : > { %v1337_v38 = vadd.f32 %v3137_v52, %v4516_v60 }
 0x2fc   : > { %v3139_v49 = vpop.f32.mrf.mxu1 }
 0x2fd   : > { %v1385_v22 = vmax.f32 %v1337_v38, 0.0  ;;  %v3140_v7 = vadd.f32 %v3139_v49, %v3138_v51 }
 0x2fe   : > { %v3141_v11 = vpop.f32.mrf.mxu1 }
 0x2ff   : > { %v1406_v57 = vpack.c.bf16 %v1385_v22, %v1384_v16  ;;  %v1342_v59 = vadd.f32 %v3140_v7, %v4516_v60 }
 0x300   : > { %v3142_v58 = vpop.f32.mrf.mxu1 }
 0x301   : > { %v3143_v62 = vadd.f32 %v3142_v58, %v3141_v11  ;;  %1641 = vmatmul.mubr.bf16.gmra.mxu0 %v1406_v57  ;;  %v1386_v5 = vmax.f32 %v1342_v59, 0.0 }
 0x302   : > { %v3144_v1 = vpop.f32.mrf.mxu1  ;;  %1650 = vmatprep.mubr.bf16.mxu0 %v3954_v0 }
 0x303   : > { %v1345_v2 = vadd.f32 %v3143_v62, %v4516_v60 }
 0x304   : > { %v3145_v3 = vpop.f32.mrf.mxu1 }
 0x305   : > { %v1387_v8 = vmax.f32 %v1345_v2, 0.0  ;;  %v3146_v10 = vadd.f32 %v3145_v3, %v3144_v1 }
 0x306   : > { %v3147_v12 = vpop.f32.mrf.mxu1 }
 0x307   : > { %v1407_v17 = vpack.c.bf16 %v1387_v8, %v1386_v5  ;;  %v1350_v20 = vadd.f32 %v3146_v10, %v4516_v60 }
 0x308   : > { %v3148_v33 = vpop.f32.mrf.mxu1 }
 0x309   : > { %v3149_v21 = vadd.f32 %v3148_v33, %v3147_v12  ;;  %1651 = vmatmul.mubr.bf16.gmra.mxu0 %v1407_v17  ;;  %v1388_v45 = vmax.f32 %v1350_v20, 0.0 }
 0x30a   : > { %v3150_v23 = vpop.f32.mrf.mxu1  ;;  %1660 = vmatprep.mubr.bf16.mxu0 %v3954_v0 }
 0x30b   : > { %v1353_v26 = vadd.f32 %v3149_v21, %v4516_v60 }
 0x30c   : > { %v3151_v28 = vpop.f32.mrf.mxu1 }
 0x30d   : > { %v1389_v47 = vmax.f32 %v1353_v26, 0.0  ;;  %v3152_v50 = vadd.f32 %v3151_v28, %v3150_v23 }
 0x30e   : > { %v3153_v40 = vpop.f32.mrf.mxu1 }
 0x30f   : > { %v1408_v42 = vpack.c.bf16 %v1389_v47, %v1388_v45  ;;  %v1358_v51 = vadd.f32 %v3152_v50, %v4516_v60 }
 0x310   : > { %v3154_v52 = vpop.f32.mrf.mxu1 }
 0x311   : > { %v3155_v38 = vadd.f32 %v3154_v52, %v3153_v40  ;;  %1661 = vmatmul.mubr.bf16.gmra.mxu0 %v1408_v42  ;;  %v1390_v7 = vmax.f32 %v1358_v51, 0.0 }
 0x312   : > { %v3156_v49 = vpop.f32.mrf.mxu1  ;;  %1670 = vmatprep.mubr.bf16.mxu0 %v3954_v0 }
 0x313   : > { %v1361_v16 = vadd.f32 %v3155_v38, %v4516_v60 }
 0x314   : > { %v3157_v22 = vpop.f32.mrf.mxu1 }
 0x315   : > { %v1391_v11 = vmax.f32 %v1361_v16, 0.0  ;;  %v3158_v57 = vadd.f32 %v3157_v22, %v3156_v49 }
 0x316   : > { %v3159_v58 = vpop.f32.mrf.mxu1 }
 0x317   : > { %v1409_v59 = vpack.c.bf16 %v1391_v11, %v1390_v7  ;;  %v1366_v1 = vadd.f32 %v3158_v57, %v4516_v60 }
 0x318   : > { %v3160_v62 = vpop.f32.mrf.mxu1 }
 0x319   : > { %v3161_v2 = vadd.f32 %v3160_v62, %v3159_v58  ;;  %1671 = vmatmul.mubr.bf16.gmra.mxu0 %v1409_v59  ;;  %v1392_v10 = vmax.f32 %v1366_v1, 0.0 }
 0x31a   : > { %v3162_v3 = vpop.f32.mrf.mxu1  ;;  %1680 = vmatprep.mubr.bf16.mxu0 %v3954_v0 }
 0x31b   : > { %v1369_v5 = vadd.f32 %v3161_v2, %v4516_v60 }
 0x31c   : > { %v3163_v8 = vpop.f32.mrf.mxu1 }
 0x31d   : > { %v1393_v12 = vmax.f32 %v1369_v5, 0.0  ;;  %v3164_v17 = vadd.f32 %v3163_v8, %v3162_v3 }
 0x31e   : > { %v3165_v33 = vpop.f32.mrf.mxu1 }
 0x31f   : > { %v1410_v20 = vpack.c.bf16 %v1393_v12, %v1392_v10  ;;  %v1374_v23 = vadd.f32 %v3164_v17, %v4516_v60 }
 0x320   : > { %v3166_v21 = vpop.f32.mrf.mxu1 }
 0x321   : > { %v3167_v26 = vadd.f32 %v3166_v21, %v3165_v33  ;;  %1681 = vmatmul.mubr.bf16.gmra.mxu0 %v1410_v20  ;;  %v1394_v45 = vmax.f32 %v1374_v23, 0.0 }
 0x322   : > { %1690 = vmatprep.mubr.bf16.mxu0 %v3954_v0 }
 0x323   : > { %v1377_v28 = vadd.f32 %v3167_v26, %v4516_v60 }
 0x325   : > { %v1395_v47 = vmax.f32 %v1377_v28, 0.0 }
 0x327   : > { %v1411_v50 = vpack.c.bf16 %v1395_v47, %v1394_v45 }
 0x329   : > { %1691 = vmatmul.mubr.bf16.gmra.mxu0 %v1411_v50 }
 0x371   : > { %v4565_v40 = vpop.f32.mrf.mxu0 }
 0x373   : > { %v4567_v42 = vpop.f32.mrf.mxu0 }
 0x375   : > { %v4569_v52 = vpop.f32.mrf.mxu0 }
 0x377   : > { %v4573_v38 = vpop.f32.mrf.mxu0 }
 0x379   : > { %v4577_v49 = vpop.f32.mrf.mxu0 }
 0x37b   : > { %v4579_v60 = vpop.f32.mrf.mxu0 }
 0x37d   : > { %v4581_v16 = vpop.f32.mrf.mxu0 }
 0x37f   : > { %v4585_v7 = vpop.f32.mrf.mxu0 }
 0x381   : > { %v4589_v57 = vpop.f32.mrf.mxu0 }
 0x383   : > { %v1564_v58 = vpop.f32.mrf.mxu0 }
 0x385   : > { %v1566_v59 = vpop.f32.mrf.mxu0 }
 0x387   : > { %v1568_v62 = vpop.f32.mrf.mxu0 }
 0x389   : > { %v1572_v1 = vpop.f32.mrf.mxu0 }
 0x38b   : > { %v1574_v2 = vpop.f32.mrf.mxu0 }
 0x38d   : > { %v1576_v3 = vpop.f32.mrf.mxu0 }
 0x38f   : > { %v1578_v5 = vpop.f32.mrf.mxu0 }
 0x391   : > { %v1582_v8 = vpop.f32.mrf.mxu0 }
 0x393   : > { %v1584_v10 = vpop.f32.mrf.mxu0 }
 0x395   : > { %v1586_v12 = vpop.f32.mrf.mxu0 }
 0x397   : > { %v1588_v17 = vpop.f32.mrf.mxu0 }
 0x399   : > { %v1592_v33 = vpop.f32.mrf.mxu0 }
 0x39b   : > { %v1594_v20 = vpop.f32.mrf.mxu0 }
 0x39d   : > { %v1596_v21 = vpop.f32.mrf.mxu0 }
 0x39f   : > { %v1598_v23 = vpop.f32.mrf.mxu0 }
 0x3a0   : > { %v1712_v43 = vpack.c.bf16 %v1598_v23, %v1594_v20  ;;  %v1708_v23 = vpack.c.bf16 %v1578_v5, %v1574_v2  ;;  %v1705_v2 = vpack.c.bf16 %v1566_v59, %v4589_v57  ;;  %v5032_v57 = vpack.c.bf16 %v4573_v38, %v4567_v42 }
 0x3a1   : > { %v1602_v26 = vpop.f32.mrf.mxu0 }
 0x3a3   : > { %v1604_v28 = vpop.f32.mrf.mxu0 }
 0x3a5   : > { %v1606_v45 = vpop.f32.mrf.mxu0 }
 0x3a6   : > { %v1713_v53 = vpack.c.bf16 %v1606_v45, %v1602_v26  ;;  %v3658_v45 = vld [vmem:[#allocation10 + $0x28] sm:$0xff]  }
 0x3a7   : > { %v1608_v47 = vpop.f32.mrf.mxu0 }
 0x3a8   : > { %v1714_v55 = vpack.c.bf16 %v1608_v47, %v1604_v28 }
 0x3a9   : > { %v1612_v50 = vpop.f32.mrf.mxu0 }
 0x3ab   : > { %v1614_v51 = vpop.f32.mrf.mxu0 }
 0x3ad   : > { %v1616_v0 = vpop.f32.mrf.mxu0 }
 0x3ae   : > { %v1715_v37 = vpack.c.bf16 %v1616_v0, %v1612_v50  ;;  %v1711_v0 = vpack.c.bf16 %v1596_v21, %v1592_v33  ;;  %v1707_v33 = vpack.c.bf16 %v1576_v3, %v1572_v1  ;;  %v3656_v1 = vld [vmem:[#allocation10 + $0x38] sm:$0xff]   ;;  %v3657_v3 = vld [vmem:[#allocation10 + $0x30] sm:$0xff]  }
 0x3af   : > { %v1618_v22 = vpop.f32.mrf.mxu0  ;;  %3344 = vmatprep.subr.bf16.mxu0 %v3656_v1 }
 0x3b0   : > { %v1716_v11 = vpack.c.bf16 %v1618_v22, %v1614_v51  ;;  %3345 = vmatpush3.bf16.msra.mxu0 %v3656_v1 }
 0x3b1   : > { %v4591_v36 = vpop.f32.mrf.mxu0  ;;  %3346 = vmatprep.subr.bf16.mxu0 %v3657_v3 }
 0x3b2   : > { %3168 = vmatprep.subr.bf16.mxu1 %v1716_v11  ;;  %v1710_v11 = vpack.c.bf16 %v1588_v17, %v1584_v10  ;;  %v1706_v17 = vpack.c.bf16 %v1568_v62, %v1564_v58  ;;  %v5031_v62 = vpack.c.bf16 %v4581_v16, %v4577_v49 }
 0x3b3   : > { %v4593_v54 = vpop.f32.mrf.mxu0  ;;  %3169 = vmatpush3.bf16.msra.mxu1 %v1715_v37 }
 0x3b4   : > { %3170 = vmatprep.subr.bf16.mxu1 %v1714_v55  ;;  %v1709_v55 = vpack.c.bf16 %v1586_v12, %v1582_v8  ;;  %v5030_v12 = vpack.c.bf16 %v4585_v7, %v4579_v60  ;;  %v5033_v7 = vpack.c.bf16 %v4569_v52, %v4565_v40  ;;  %3347 = vmatpush3.bf16.msra.mxu0 %v3657_v3 }
 0x3b5   : > { %v4595_v41 = vpop.f32.mrf.mxu0  ;;  %3348 = vmatprep.subr.bf16.mxu0 %v3658_v45 }
 0x3b6   : > { %v1717_v31 = vpack.c.bf16 %v4595_v41, %v4591_v36  ;;  %v5040_v41 = vld [vmem:[#allocation33_spill] sm:$0xff]  ;;  %v4689_v36 = vld [vmem:[%s4961_s5] ss:$0 sm:$0xff] }
 0x3b7   : > { %v4599_v27 = vpop.f32.mrf.mxu0  ;;  %3171 = vmatpush3.bf16.msra.mxu1 %v1713_v53 }
 0x3b8   : > { %v1718_v51 = vpack.c.bf16 %v4599_v27, %v4593_v54  ;;  %3172 = vmatprep.subr.bf16.mxu1 %v1712_v43  ;;  %3349 = vmatpush3.bf16.msra.mxu0 %v3658_v45  ;;  %v5036_v27 = vld [vmem:[#allocation29_spill] sm:$0xff] }
 0x3b9   : > { %v4603_v22 = vpop.f32.mrf.mxu0 }
 0x3bb   : > { %v4605_v37 = vpop.f32.mrf.mxu0  ;;  %3173 = vmatpush3.bf16.msra.mxu1 %v1711_v0 }
 0x3bc   : > { %3174 = vmatprep.subr.bf16.mxu1 %v1710_v11 }
 0x3bd   : > { %v4607_v20 = vpop.f32.mrf.mxu0 }
 0x3be   : > { %v1719_v26 = vpack.c.bf16 %v4607_v20, %v4603_v22 }
 0x3bf   : > { %v4611_v53 = vpop.f32.mrf.mxu0  ;;  %3175 = vmatpush3.bf16.msra.mxu1 %v1709_v55 }
 0x3c0   : > { %v1720_v43 = vpack.c.bf16 %v4611_v53, %v4605_v37  ;;  %3176 = vmatprep.subr.bf16.mxu1 %v1708_v23  ;;  %v3665_v53 = vld [vmem:[#allocation11 + $0x30] sm:$0xff]  }
 0x3c1   : > { %v4615_v10 = vpop.f32.mrf.mxu0 }
 0x3c3   : > { %v4617_v21 = vpop.f32.mrf.mxu0  ;;  %3177 = vmatpush3.bf16.msra.mxu1 %v1707_v33 }
 0x3c4   : > { %3178 = vmatprep.subr.bf16.mxu1 %v1706_v17 }
 0x3c5   : > { %v4620_v5 = vpop.f32.mrf.mxu0 }
 0x3c7   : > { %v4622_v8 = vpop.f32.mrf.mxu0  ;;  %3179 = vmatpush3.bf16.msra.mxu1 %v1705_v2 }
 0x3c8   : > { %3180 = vmatprep.subr.bf16.mxu1 %v5030_v12 }
 0x3c9   : > { %v4627_v28 = vpop.f32.mrf.mxu0 }
 0x3cb   : > { %v1654_v58 = vpop.f32.mrf.mxu0  ;;  %3181 = vmatpush3.bf16.msra.mxu1 %v5031_v62 }
 0x3cc   : > { %3182 = vmatprep.subr.bf16.mxu1 %v5032_v57 }
 0x3cd   : > { %v1656_v59 = vpop.f32.mrf.mxu0 }
 0x3cf   : > { %v1658_v60 = vpop.f32.mrf.mxu0  ;;  %3183 = vmatpush3.bf16.msra.mxu1 %v5033_v7 }
 0x3d0   : > { %v1724_v1 = vpack.c.bf16 %v1658_v60, %v1654_v58 }
 0x3d1   : > { %v1662_v47 = vpop.f32.mrf.mxu0 }
 0x3d2   : > { %1773 = vmatmul.mubr.bf16.vlgmr.msra.gmra.mxu1 %v4363_v46 }
 0x3d3   : > { %v1664_v49 = vpop.f32.mrf.mxu0  ;;  %1780 = vmatprep.mubr.bf16.mxu1 %v4371_v39 }
 0x3d5   : > { %v1666_v42 = vpop.f32.mrf.mxu0 }
 0x3d7   : > { %v1668_v38 = vpop.f32.mrf.mxu0 }
 0x3d8   : > { %v1726_v12 = vpack.c.bf16 %v1668_v38, %v1664_v49  ;;  %v3668_v49 = vld [vmem:[#allocation11 + $0x18] sm:$0xff]  }
 0x3d9   : > { %v1672_v16 = vpop.f32.mrf.mxu0 }
 0x3da   : > { %1781 = vmatmul.mubr.bf16.gmra.mxu1 %v4378_v34 }
 0x3db   : > { %v1674_v50 = vpop.f32.mrf.mxu0  ;;  %1788 = vmatprep.mubr.bf16.mxu1 %v4381_v56 }
 0x3dd   : > { %v1676_v0 = vpop.f32.mrf.mxu0 }
 0x3df   : > { %v1678_v40 = vpop.f32.mrf.mxu0 }
 0x3e1   : > { %v1682_v52 = vpop.f32.mrf.mxu0 }
 0x3e2   : > { %1789 = vmatmul.mubr.bf16.gmra.mxu1 %v4386_v61 }
 0x3e3   : > { %v1684_v11 = vpop.f32.mrf.mxu0  ;;  %1796 = vmatprep.mubr.bf16.mxu1 %v4389_v63  ;;  %v1728_v63 = vpack.c.bf16 %v1678_v40, %v1674_v50 }
 0x3e5   : > { %v1686_v46 = vpop.f32.mrf.mxu0 }
 0x3e6   : > { %v1729_v61 = vpack.c.bf16 %v1686_v46, %v1682_v52 }
 0x3e7   : > { %v1688_v55 = vpop.f32.mrf.mxu0 }
 0x3e8   : > { %v1730_v2 = vpack.c.bf16 %v1688_v55, %v1684_v11 }
 0x3e9   : > { %v1692_v39 = vpop.f32.mrf.mxu0 }
 0x3ea   : > { %1797 = vmatmul.mubr.bf16.gmra.mxu1 %v4394_v4  ;;  %v1727_v4 = vpack.c.bf16 %v1676_v0, %v1672_v16 }
 0x3eb   : > { %v1694_v23 = vpop.f32.mrf.mxu0  ;;  %1804 = vmatprep.mubr.bf16.mxu1 %v4397_v6  ;;  %v1725_v6 = vpack.c.bf16 %v1666_v42, %v1662_v47 }
 0x3ed   : > { %v1696_v34 = vpop.f32.mrf.mxu0 }
 0x3ee   : > { %v1731_v56 = vpack.c.bf16 %v1696_v34, %v1692_v39 }
 0x3ef   : > { %v1698_v33 = vpop.f32.mrf.mxu0 }
 0x3f0   : > { %v1732_v17 = vpack.c.bf16 %v1698_v33, %v1694_v23 }
 0x3f2   : > { %3232 = vmatprep.subr.bf16.mxu1 %v1732_v17  ;;  %1805 = vmatmul.mubr.bf16.gmra.mxu1 %v4402_v15  ;;  %v1723_v15 = vpack.c.bf16 %v1656_v59, %v4627_v28  ;;  %v3667_v59 = vld [vmem:[#allocation11 + $0x20] sm:$0xff]  }
 0x3f3   : > { %3233 = vmatpush3.bf16.msra.mxu1 %v1731_v56  ;;  %1812 = vmatprep.mubr.bf16.mxu1 %v4405_v19  ;;  %v1722_v19 = vpack.c.bf16 %v4622_v8, %v4617_v21  ;;  %v3666_v8 = vld [vmem:[#allocation11 + $0x28] sm:$0xff]  }
 0x3f4   : > { %3234 = vmatprep.subr.bf16.mxu1 %v1730_v2 }
 0x3f7   : > { %3235 = vmatpush3.bf16.msra.mxu1 %v1729_v61 }
 0x3f8   : > { %3236 = vmatprep.subr.bf16.mxu1 %v1728_v63 }
 0x3fa   : > { %1813 = vmatmul.mubr.bf16.gmra.mxu1 %v4410_v30  ;;  %v1721_v30 = vpack.c.bf16 %v4620_v5, %v4615_v10 }
 0x3fb   : > { %3237 = vmatpush3.bf16.msra.mxu1 %v1727_v4  ;;  %1820 = vmatprep.mubr.bf16.mxu1 %v4413_v32  ;;  %v3659_v32 = vld [vmem:[#allocation10 + $0x20] sm:$0xff]  }
 0x3fc   : > { %3238 = vmatprep.subr.bf16.mxu1 %v1726_v12  ;;  %3350 = vmatprep.subr.bf16.mxu0 %v3659_v32 }
 0x3fd   : > { %3351 = vmatpush3.bf16.msra.mxu0 %v3659_v32 }
 0x3ff   : > { %3239 = vmatpush3.bf16.msra.mxu1 %v1725_v6 }
 0x400   : > { %3240 = vmatprep.subr.bf16.mxu1 %v1724_v1 }
 0x402   : > { %1821 = vmatmul.mubr.bf16.gmra.mxu1 %v4421_v44  ;;  %v3660_v44 = vld [vmem:[#allocation10 + $0x18] sm:$0xff]  }
 0x403   : > { %3241 = vmatpush3.bf16.msra.mxu1 %v1723_v15  ;;  %1828 = vmatprep.mubr.bf16.mxu1 %v4424_v35  ;;  %v3661_v35 = vld [vmem:[#allocation10 + $0x10] sm:$0xff]  }
 0x404   : > { %3242 = vmatprep.subr.bf16.mxu1 %v1722_v19  ;;  %3352 = vmatprep.subr.bf16.mxu0 %v3660_v44 }
 0x405   : > { %3353 = vmatpush3.bf16.msra.mxu0 %v3660_v44 }
 0x406   : > { %3354 = vmatprep.subr.bf16.mxu0 %v3661_v35 }
 0x407   : > { %3243 = vmatpush3.bf16.msra.mxu1 %v1721_v30 }
 0x408   : > { %3244 = vmatprep.subr.bf16.mxu1 %v1720_v43 }
 0x409   : > { %3355 = vmatpush3.bf16.msra.mxu0 %v3661_v35 }
 0x40a   : > { %1829 = vmatmul.mubr.bf16.gmra.mxu1 %v4437_v48  ;;  %v3662_v48 = vld [vmem:[#allocation10 + $0x8] sm:$0xff]  }
 0x40b   : > { %3245 = vmatpush3.bf16.msra.mxu1 %v1719_v26  ;;  %1988 = vmatprep.mubr.bf16.mxu1 %v4440_v29  ;;  %v3663_v29 = vld [vmem:[#allocation10] sm:$0xff]   ;;  %v3664_v26 = vld [vmem:[#allocation11 + $0x38] sm:$0xff]  }
 0x40c   : > { %3246 = vmatprep.subr.bf16.mxu1 %v1718_v51  ;;  %3356 = vmatprep.subr.bf16.mxu0 %v3662_v48 }
 0x40d   : > { %3357 = vmatpush3.bf16.msra.mxu0 %v3662_v48 }
 0x40e   : > { %3358 = vmatprep.subr.bf16.mxu0 %v3663_v29 }
 0x40f   : > { %3247 = vmatpush3.bf16.msra.mxu1 %v1717_v31  ;;  %v5039_v31 = vld [vmem:[#allocation32_spill] sm:$0xff] }
 0x410   : > { %3392 = vmatprep.subr.bf16.mxu1 %v3664_v26 }
 0x411   : > { %3359 = vmatpush3.bf16.msra.mxu0 %v3663_v29 }
 0x412   : > { %1989 = vmatmul.mubr.bf16.vlgmr.msra.gmra.mxu1 %v4450_v18  ;;  %v5034_v18 = vld [vmem:[#allocation27_spill] sm:$0xff] }
 0x413   : > { %1996 = vmatprep.mubr.bf16.mxu1 %v4456_v25  ;;  %v5035_v25 = vld [vmem:[#allocation28_spill] sm:$0xff]  ;;  %3393 = vmatpush3.bf16.msra.mxu1 %v3664_v26 }
 0x414   : > { %3394 = vmatprep.subr.bf16.mxu1 %v3665_v53 }
 0x417   : > { %3395 = vmatpush3.bf16.msra.mxu1 %v3665_v53 }
 0x418   : > { %3396 = vmatprep.subr.bf16.mxu1 %v3666_v8 }
 0x41a   : > { %1997 = vmatmul.mubr.bf16.gmra.mxu1 %v4461_v9  ;;  %v5037_v9 = vld [vmem:[#allocation30_spill] sm:$0xff] }
 0x41b   : > { %2004 = vmatprep.mubr.bf16.mxu1 %v4464_v14  ;;  %v5038_v14 = vld [vmem:[#allocation31_spill] sm:$0xff]  ;;  %3397 = vmatpush3.bf16.msra.mxu1 %v3666_v8 }
 0x41c   : > { %3398 = vmatprep.subr.bf16.mxu1 %v3667_v59 }
 0x41f   : > { %3399 = vmatpush3.bf16.msra.mxu1 %v3667_v59 }
 0x420   : > { %3400 = vmatprep.subr.bf16.mxu1 %v3668_v49 }
 0x422   : > { %2005 = vmatmul.mubr.bf16.gmra.mxu1 %v4469_v13  ;;  %v5041_v13 = vld [vmem:[#allocation34_spill] sm:$0xff] }
 0x423   : > { %2012 = vmatprep.mubr.bf16.mxu1 %v4472_v24  ;;  %v5042_v24 = vld [vmem:[#allocation35_spill] sm:$0xff]  ;;  %3401 = vmatpush3.bf16.msra.mxu1 %v3668_v49 }
 0x42a   : > { %2013 = vmatmul.mubr.bf16.gmra.mxu1 %v5034_v18 }
 0x42b   : > { %2020 = vmatprep.mubr.bf16.mxu1 %v5035_v25 }
 0x432   : > { %2021 = vmatmul.mubr.bf16.gmra.mxu1 %v5036_v27 }
 0x433   : > { %2028 = vmatprep.mubr.bf16.mxu1 %v5037_v9 }
 0x43a   : > { %2029 = vmatmul.mubr.bf16.gmra.mxu1 %v5038_v14 }
 0x43b   : > { %2036 = vmatprep.mubr.bf16.mxu1 %v5039_v31 }
 0x442   : > { %2037 = vmatmul.mubr.bf16.gmra.mxu1 %v5040_v41 }
 0x443   : > { %2044 = vmatprep.mubr.bf16.mxu1 %v5041_v13 }
 0x44a   : > { %2045 = vmatmul.mubr.bf16.gmra.mxu1 %v5042_v24 }
 0x492   : > { %v3184_v54 = vpop.f32.mrf.mxu1 }
 0x494   : > { %v3185_v51 = vpop.f32.mrf.mxu1 }
 0x495   : > { %v3186_v22 = vadd.f32 %v3185_v51, %v3184_v54 }
 0x496   : > { %v3187_v37 = vpop.f32.mrf.mxu1 }
 0x497   : > { %v1775_v20 = vadd.f32 %v3186_v22, %v4689_v36 }
 0x498   : > { %v3188_v43 = vpop.f32.mrf.mxu1 }
 0x499   : > { %1837 = vst [vmem:[%s4693_s12] sm:$0xff] %v1775_v20  ;;  %v3189_v10 = vadd.f32 %v3188_v43, %v3187_v37 }
 0x49a   : > { %v3190_v21 = vpop.f32.mrf.mxu1 }
 0x49b   : > { %v1778_v5 = vadd.f32 %v3189_v10, %v4689_v36 }
 0x49c   : > { %v3191_v28 = vpop.f32.mrf.mxu1 }
 0x49d   : > { %1838 = vst [vmem:[%s4693_s12 + $0x8] sm:$0xff] %v1778_v5  ;;  %v3192_v3 = vadd.f32 %v3191_v28, %v3190_v21  ;;  %v2070_v58 = vpack.c.bf16 %v1778_v5, %v1775_v20 }
 0x49e   : > { %v3193_v62 = vpop.f32.mrf.mxu1 }
 0x49f   : > { %v1783_v57 = vadd.f32 %v3192_v3, %v4689_v36  ;;  %3360 = vmatprep.mubr.bf16.mxu0 %v2070_v58 }
 0x4a0   : > { %v3194_v45 = vpop.f32.mrf.mxu1 }
 0x4a1   : > { %1839 = vst [vmem:[%s4693_s12 + $0x10] sm:$0xff] %v1783_v57  ;;  %v3195_v60 = vadd.f32 %v3194_v45, %v3193_v62 }
 0x4a2   : > { %v3196_v7 = vpop.f32.mrf.mxu1 }
 0x4a3   : > { %v1786_v47 = vadd.f32 %v3195_v60, %v4689_v36 }
 0x4a4   : > { %v3197_v42 = vpop.f32.mrf.mxu1 }
 0x4a5   : > { %1840 = vst [vmem:[%s4693_s12 + $0x18] sm:$0xff] %v1786_v47  ;;  %v2071_v38 = vpack.c.bf16 %v1786_v47, %v1783_v57  ;;  %v3198_v16 = vadd.f32 %v3197_v42, %v3196_v7 }
 0x4a6   : > { %v3199_v50 = vpop.f32.mrf.mxu1 }
 0x4a7   : > { %v1791_v0 = vadd.f32 %v3198_v16, %v4689_v36  ;;  %3361 = vmatmul.mubr.bf16.vlgmr.msra.gmra.mxu0 %v2071_v38 }
 0x4a8   : > { %v3200_v40 = vpop.f32.mrf.mxu1 }
 0x4a9   : > { %1841 = vst [vmem:[%s4693_s12 + $0x20] sm:$0xff] %v1791_v0  ;;  %v3201_v52 = vadd.f32 %v3200_v40, %v3199_v50 }
 0x4aa   : > { %v3202_v11 = vpop.f32.mrf.mxu1 }
 0x4ab   : > { %v1794_v46 = vadd.f32 %v3201_v52, %v4689_v36 }
 0x4ac   : > { %v3203_v55 = vpop.f32.mrf.mxu1 }
 0x4ad   : > { %1842 = vst [vmem:[%s4693_s12 + $0x28] sm:$0xff] %v1794_v46  ;;  %v3204_v39 = vadd.f32 %v3203_v55, %v3202_v11  ;;  %v2072_v23 = vpack.c.bf16 %v1794_v46, %v1791_v0 }
 0x4ae   : > { %v3205_v34 = vpop.f32.mrf.mxu1 }
 0x4af   : > { %v1799_v33 = vadd.f32 %v3204_v39, %v4689_v36  ;;  %3364 = vmatprep.mubr.bf16.mxu0 %v2072_v23 }
 0x4b0   : > { %v3206_v17 = vpop.f32.mrf.mxu1 }
 0x4b1   : > { %1843 = vst [vmem:[%s4693_s12 + $0x30] sm:$0xff] %v1799_v33  ;;  %v3207_v56 = vadd.f32 %v3206_v17, %v3205_v34  ;;  %v3669_v17 = vld [vmem:[#allocation11 + $0x10] sm:$0xff]  }
 0x4b2   : > { %v3208_v2 = vpop.f32.mrf.mxu1  ;;  %3402 = vmatprep.subr.bf16.mxu1 %v3669_v17 }
 0x4b3   : > { %v1802_v61 = vadd.f32 %v3207_v56, %v4689_v36  ;;  %3403 = vmatpush3.bf16.msra.mxu1 %v3669_v17 }
 0x4b4   : > { %v3209_v63 = vpop.f32.mrf.mxu1 }
 0x4b5   : > { %1844 = vst [vmem:[%s4693_s12 + $0x38] sm:$0xff] %v1802_v61  ;;  %v2073_v4 = vpack.c.bf16 %v1802_v61, %v1799_v33  ;;  %v3210_v12 = vadd.f32 %v3209_v63, %v3208_v2 }
 0x4b6   : > { %v3211_v6 = vpop.f32.mrf.mxu1 }
 0x4b7   : > { %v1807_v1 = vadd.f32 %v3210_v12, %v4689_v36  ;;  %3365 = vmatmul.mubr.bf16.gmra.mxu0 %v2073_v4  ;;  %v3670_v4 = vld [vmem:[#allocation11 + $0x8] sm:$0xff]  }
 0x4b8   : > { %v3212_v15 = vpop.f32.mrf.mxu1  ;;  %3404 = vmatprep.subr.bf16.mxu1 %v3670_v4 }
 0x4b9   : > { %1845 = vst [vmem:[%s4693_s12 + $0x40] sm:$0xff] %v1807_v1  ;;  %v3213_v19 = vadd.f32 %v3212_v15, %v3211_v6  ;;  %3405 = vmatpush3.bf16.msra.mxu1 %v3670_v4 }
 0x4ba   : > { %v3214_v30 = vpop.f32.mrf.mxu1 }
 0x4bb   : > { %v1810_v32 = vadd.f32 %v3213_v19, %v4689_v36 }
 0x4bc   : > { %v3215_v44 = vpop.f32.mrf.mxu1 }
 0x4bd   : > { %1846 = vst [vmem:[%s4693_s12 + $0x48] sm:$0xff] %v1810_v32  ;;  %v3216_v35 = vadd.f32 %v3215_v44, %v3214_v30  ;;  %v2074_v48 = vpack.c.bf16 %v1810_v32, %v1807_v1  ;;  %v3671_v30 = vld [vmem:[#allocation11] sm:$0xff]  }
 0x4be   : > { %v3217_v29 = vpop.f32.mrf.mxu1  ;;  %3406 = vmatprep.subr.bf16.mxu1 %v3671_v30 }
 0x4bf   : > { %v1815_v18 = vadd.f32 %v3216_v35, %v4689_v36  ;;  %3368 = vmatprep.mubr.bf16.mxu0 %v2074_v48  ;;  %3407 = vmatpush3.bf16.msra.mxu1 %v3671_v30 }
 0x4c0   : > { %v3218_v25 = vpop.f32.mrf.mxu1 }
 0x4c1   : > { %1847 = vst [vmem:[%s4693_s12 + $0x50] sm:$0xff] %v1815_v18  ;;  %v3219_v27 = vadd.f32 %v3218_v25, %v3217_v29 }
 0x4c2   : > { %v3220_v9 = vpop.f32.mrf.mxu1 }
 0x4c3   : > { %v1818_v14 = vadd.f32 %v3219_v27, %v4689_v36 }
 0x4c4   : > { %v3221_v31 = vpop.f32.mrf.mxu1 }
 0x4c5   : > { %1848 = vst [vmem:[%s4693_s12 + $0x58] sm:$0xff] %v1818_v14  ;;  %v2075_v41 = vpack.c.bf16 %v1818_v14, %v1815_v18  ;;  %v3222_v13 = vadd.f32 %v3221_v31, %v3220_v9 }
 0x4c6   : > { %v3223_v24 = vpop.f32.mrf.mxu1 }
 0x4c7   : > { %v1823_v54 = vadd.f32 %v3222_v13, %v4689_v36  ;;  %3369 = vmatmul.mubr.bf16.gmra.mxu0 %v2075_v41 }
 0x4c8   : > { %v3224_v51 = vpop.f32.mrf.mxu1 }
 0x4c9   : > { %1849 = vst [vmem:[%s4693_s12 + $0x60] sm:$0xff] %v1823_v54  ;;  %v3225_v22 = vadd.f32 %v3224_v51, %v3223_v24 }
 0x4ca   : > { %v3226_v37 = vpop.f32.mrf.mxu1 }
 0x4cb   : > { %v1826_v20 = vadd.f32 %v3225_v22, %v4689_v36 }
 0x4cc   : > { %v3227_v26 = vpop.f32.mrf.mxu1 }
 0x4cd   : > { %1850 = vst [vmem:[%s4693_s12 + $0x68] sm:$0xff] %v1826_v20  ;;  %v3228_v53 = vadd.f32 %v3227_v26, %v3226_v37  ;;  %v2076_v43 = vpack.c.bf16 %v1826_v20, %v1823_v54 }
 0x4ce   : > { %v3229_v10 = vpop.f32.mrf.mxu1 }
 0x4cf   : > { %v1831_v21 = vadd.f32 %v3228_v53, %v4689_v36  ;;  %3372 = vmatprep.mubr.bf16.mxu0 %v2076_v43 }
 0x4d0   : > { %v3230_v5 = vpop.f32.mrf.mxu1 }
 0x4d1   : > { %1851 = vst [vmem:[%s4693_s12 + $0x70] sm:$0xff] %v1831_v21  ;;  %v3231_v8 = vadd.f32 %v3230_v5, %v3229_v10 }
 0x4d2   : > { %v3248_v28 = vpop.f32.mrf.mxu1 }
 0x4d3   : > { %v1834_v3 = vadd.f32 %v3231_v8, %v4689_v36 }
 0x4d4   : > { %v3249_v58 = vpop.f32.mrf.mxu1 }
 0x4d5   : > { %1852 = vst [vmem:[%s4693_s12 + $0x78] sm:$0xff] %v1834_v3  ;;  %v2077_v62 = vpack.c.bf16 %v1834_v3, %v1831_v21  ;;  %v3250_v57 = vadd.f32 %v3249_v58, %v3248_v28 }
 0x4d6   : > { %v3251_v59 = vpop.f32.mrf.mxu1 }
 0x4d7   : > { %v1991_v45 = vadd.f32 %v3250_v57, %v4689_v36  ;;  %3373 = vmatmul.mubr.bf16.gmra.mxu0 %v2077_v62 }
 0x4d8   : > { %v3252_v60 = vpop.f32.mrf.mxu1 }
 0x4d9   : > { %2988 = vst [vmem:[%s4693_s12 + $0x80] sm:$0xff] %v1991_v45  ;;  %v3253_v7 = vadd.f32 %v3252_v60, %v3251_v59 }
 0x4da   : > { %v3254_v47 = vpop.f32.mrf.mxu1 }
 0x4db   : > { %v1994_v49 = vadd.f32 %v3253_v7, %v4689_v36 }
 0x4dc   : > { %v3255_v42 = vpop.f32.mrf.mxu1 }
 0x4dd   : > { %2989 = vst [vmem:[%s4693_s12 + $0x88] sm:$0xff] %v1994_v49  ;;  %v3256_v38 = vadd.f32 %v3255_v42, %v3254_v47  ;;  %v2078_v16 = vpack.c.bf16 %v1994_v49, %v1991_v45 }
 0x4de   : > { %v3257_v50 = vpop.f32.mrf.mxu1 }
 0x4df   : > { %v1999_v0 = vadd.f32 %v3256_v38, %v4689_v36  ;;  %3376 = vmatprep.mubr.bf16.mxu0 %v2078_v16 }
 0x4e0   : > { %v3258_v40 = vpop.f32.mrf.mxu1 }
 0x4e1   : > { %2990 = vst [vmem:[%s4693_s12 + $0x90] sm:$0xff] %v1999_v0  ;;  %v3259_v52 = vadd.f32 %v3258_v40, %v3257_v50  ;;  %v4761_v40 = vld [vmem:[%s4963_s7] ss:$0 sm:$0xff] }
 0x4e2   : > { %v3260_v11 = vpop.f32.mrf.mxu1 }
 0x4e3   : > { %v2002_v46 = vadd.f32 %v3259_v52, %v4689_v36 }
 0x4e4   : > { %v3261_v55 = vpop.f32.mrf.mxu1 }
 0x4e5   : > { %2991 = vst [vmem:[%s4693_s12 + $0x98] sm:$0xff] %v2002_v46  ;;  %v2079_v39 = vpack.c.bf16 %v2002_v46, %v1999_v0  ;;  %v3262_v23 = vadd.f32 %v3261_v55, %v3260_v11 }
 0x4e6   : > { %v3263_v34 = vpop.f32.mrf.mxu1 }
 0x4e7   : > { %v2007_v33 = vadd.f32 %v3262_v23, %v4689_v36  ;;  %3377 = vmatmul.mubr.bf16.gmra.mxu0 %v2079_v39 }
 0x4e8   : > { %v3264_v56 = vpop.f32.mrf.mxu1 }
 0x4e9   : > { %2992 = vst [vmem:[%s4693_s12 + $0xa0] sm:$0xff] %v2007_v33  ;;  %v3265_v2 = vadd.f32 %v3264_v56, %v3263_v34 }
 0x4ea   : > { %v3266_v61 = vpop.f32.mrf.mxu1 }
 0x4eb   : > { %v2010_v63 = vadd.f32 %v3265_v2, %v4689_v36 }
 0x4ec   : > { %v3267_v12 = vpop.f32.mrf.mxu1 }
 0x4ed   : > { %2993 = vst [vmem:[%s4693_s12 + $0xa8] sm:$0xff] %v2010_v63  ;;  %v3268_v6 = vadd.f32 %v3267_v12, %v3266_v61  ;;  %v2080_v1 = vpack.c.bf16 %v2010_v63, %v2007_v33 }
 0x4ee   : > { %v3269_v15 = vpop.f32.mrf.mxu1 }
 0x4ef   : > { %v2015_v19 = vadd.f32 %v3268_v6, %v4689_v36  ;;  %3380 = vmatprep.mubr.bf16.mxu0 %v2080_v1 }
 0x4f0   : > { %v3270_v32 = vpop.f32.mrf.mxu1 }
 0x4f1   : > { %2994 = vst [vmem:[%s4693_s12 + $0xb0] sm:$0xff] %v2015_v19  ;;  %v3271_v44 = vadd.f32 %v3270_v32, %v3269_v15 }
 0x4f2   : > { %v3272_v35 = vpop.f32.mrf.mxu1 }
 0x4f3   : > { %v2018_v48 = vadd.f32 %v3271_v44, %v4689_v36 }
 0x4f4   : > { %v3273_v29 = vpop.f32.mrf.mxu1 }
 0x4f5   : > { %2995 = vst [vmem:[%s4693_s12 + $0xb8] sm:$0xff] %v2018_v48  ;;  %v2081_v18 = vpack.c.bf16 %v2018_v48, %v2015_v19  ;;  %v3274_v25 = vadd.f32 %v3273_v29, %v3272_v35 }
 0x4f6   : > { %v3275_v27 = vpop.f32.mrf.mxu1 }
 0x4f7   : > { %v2023_v9 = vadd.f32 %v3274_v25, %v4689_v36  ;;  %3381 = vmatmul.mubr.bf16.gmra.mxu0 %v2081_v18 }
 0x4f8   : > { %v3276_v14 = vpop.f32.mrf.mxu1 }
 0x4f9   : > { %2996 = vst [vmem:[%s4693_s12 + $0xc0] sm:$0xff] %v2023_v9  ;;  %v3277_v31 = vadd.f32 %v3276_v14, %v3275_v27 }
 0x4fa   : > { %v3278_v41 = vpop.f32.mrf.mxu1 }
 0x4fb   : > { %v2026_v13 = vadd.f32 %v3277_v31, %v4689_v36 }
 0x4fc   : > { %v3279_v24 = vpop.f32.mrf.mxu1 }
 0x4fd   : > { %2997 = vst [vmem:[%s4693_s12 + $0xc8] sm:$0xff] %v2026_v13  ;;  %v3280_v54 = vadd.f32 %v3279_v24, %v3278_v41  ;;  %v2082_v51 = vpack.c.bf16 %v2026_v13, %v2023_v9 }
 0x4fe   : > { %v3281_v22 = vpop.f32.mrf.mxu1 }
 0x4ff   : > { %v2031_v37 = vadd.f32 %v3280_v54, %v4689_v36  ;;  %3384 = vmatprep.mubr.bf16.mxu0 %v2082_v51 }
 0x500   : > { %v3282_v20 = vpop.f32.mrf.mxu1 }
 0x501   : > { %2998 = vst [vmem:[%s4693_s12 + $0xd0] sm:$0xff] %v2031_v37  ;;  %v3283_v26 = vadd.f32 %v3282_v20, %v3281_v22 }
 0x502   : > { %v3284_v53 = vpop.f32.mrf.mxu1 }
 0x503   : > { %v2034_v43 = vadd.f32 %v3283_v26, %v4689_v36 }
 0x504   : > { %v3285_v10 = vpop.f32.mrf.mxu1 }
 0x505   : > { %2999 = vst [vmem:[%s4693_s12 + $0xd8] sm:$0xff] %v2034_v43  ;;  %v2083_v21 = vpack.c.bf16 %v2034_v43, %v2031_v37  ;;  %v3286_v5 = vadd.f32 %v3285_v10, %v3284_v53 }
 0x506   : > { %v3287_v8 = vpop.f32.mrf.mxu1 }
 0x507   : > { %v2039_v28 = vadd.f32 %v3286_v5, %v4689_v36  ;;  %3385 = vmatmul.mubr.bf16.gmra.mxu0 %v2083_v21 }
 0x508   : > { %v3288_v3 = vpop.f32.mrf.mxu1 }
 0x509   : > { %3000 = vst [vmem:[%s4693_s12 + $0xe0] sm:$0xff] %v2039_v28  ;;  %v3289_v58 = vadd.f32 %v3288_v3, %v3287_v8 }
 0x50a   : > { %v3290_v62 = vpop.f32.mrf.mxu1 }
 0x50b   : > { %v2042_v57 = vadd.f32 %v3289_v58, %v4689_v36 }
 0x50c   : > { %v3291_v59 = vpop.f32.mrf.mxu1 }
 0x50d   : > { %3001 = vst [vmem:[%s4693_s12 + $0xe8] sm:$0xff] %v2042_v57  ;;  %v3292_v45 = vadd.f32 %v3291_v59, %v3290_v62  ;;  %v2084_v60 = vpack.c.bf16 %v2042_v57, %v2039_v28 }
 0x50e   : > { %v3293_v7 = vpop.f32.mrf.mxu1 }
 0x50f   : > { %v2047_v47 = vadd.f32 %v3292_v45, %v4689_v36  ;;  %3388 = vmatprep.mubr.bf16.mxu0 %v2084_v60 }
 0x510   : > { %v3294_v49 = vpop.f32.mrf.mxu1 }
 0x511   : > { %3002 = vst [vmem:[%s4693_s12 + $0xf0] sm:$0xff] %v2047_v47  ;;  %v3295_v42 = vadd.f32 %v3294_v49, %v3293_v7 }
 0x513   : > { %v2050_v38 = vadd.f32 %v3295_v42, %v4689_v36 }
 0x515   : > { %3003 = vst [vmem:[%s4693_s12 + $0xf8] sm:$0xff] %v2050_v38  ;;  %v2085_v16 = vpack.c.bf16 %v2050_v38, %v2047_v47 }
 0x517   : > { %3389 = vmatmul.mubr.bf16.gmra.mxu0 %v2085_v16 }
 0x567   : > { %v3362_v50 = vpop.f32.mrf.mxu0 }
 0x568   : > { %v2200_v55 = vadd.f32 %v3362_v50, %v4761_v40 }
 0x569   : > { %v2191_v0 = vpop.f32.mrf.mxu0 }
 0x56a   : > { %v2192_v11 = vadd.f32 %v4761_v40, %v2191_v0  ;;  %v2320_v17 = vmax.f32 %v2200_v55, 0.0 }
 0x56b   : > { %v3363_v52 = vpop.f32.mrf.mxu0 }
 0x56c   : > { %v2203_v46 = vadd.f32 %v3363_v52, %v4761_v40  ;;  %v2318_v34 = vmax.f32 %v2192_v11, 0.0 }
 0x56d   : > { %v2194_v39 = vpop.f32.mrf.mxu0 }
 0x56e   : > { %v2195_v36 = vadd.f32 %v4761_v40, %v2194_v39  ;;  %v2321_v23 = vmax.f32 %v2203_v46, 0.0 }
 0x570   : > { %v2319_v33 = vmax.f32 %v2195_v36, 0.0  ;;  %v2351_v2 = vpack.c.bf16 %v2321_v23, %v2320_v17 }
 0x572   : > { %v2350_v56 = vpack.c.bf16 %v2319_v33, %v2318_v34 }
 0x574   : > { %3408 = vmatprep.mubr.bf16.mxu1 %v2350_v56 }
 0x575   : > { %3409 = vmatmul.mubr.bf16.vlgmr.msra.gmra.mxu1 %v2351_v2 }
 0x577   : > { %v3366_v61 = vpop.f32.mrf.mxu0 }
 0x578   : > { %v2216_v1 = vadd.f32 %v3366_v61, %v4761_v40 }
 0x579   : > { %v2207_v63 = vpop.f32.mrf.mxu0 }
 0x57a   : > { %v2208_v12 = vadd.f32 %v4761_v40, %v2207_v63  ;;  %v2324_v35 = vmax.f32 %v2216_v1, 0.0 }
 0x57b   : > { %v3367_v4 = vpop.f32.mrf.mxu0 }
 0x57c   : > { %v2219_v6 = vadd.f32 %v3367_v4, %v4761_v40  ;;  %v2322_v32 = vmax.f32 %v2208_v12, 0.0 }
 0x57d   : > { %v2210_v15 = vpop.f32.mrf.mxu0 }
 0x57e   : > { %v2211_v19 = vadd.f32 %v4761_v40, %v2210_v15  ;;  %v2325_v30 = vmax.f32 %v2219_v6, 0.0 }
 0x580   : > { %v2323_v44 = vmax.f32 %v2211_v19, 0.0  ;;  %v2353_v29 = vpack.c.bf16 %v2325_v30, %v2324_v35 }
 0x582   : > { %v2352_v48 = vpack.c.bf16 %v2323_v44, %v2322_v32 }
 0x584   : > { %3412 = vmatprep.mubr.bf16.mxu1 %v2352_v48 }
 0x585   : > { %3413 = vmatmul.mubr.bf16.gmra.mxu1 %v2353_v29 }
 0x587   : > { %v3370_v18 = vpop.f32.mrf.mxu0 }
 0x588   : > { %v2232_v31 = vadd.f32 %v3370_v18, %v4761_v40 }
 0x589   : > { %v2223_v25 = vpop.f32.mrf.mxu0 }
 0x58a   : > { %v2224_v9 = vadd.f32 %v4761_v40, %v2223_v25  ;;  %v2328_v22 = vmax.f32 %v2232_v31, 0.0 }
 0x58b   : > { %v3371_v27 = vpop.f32.mrf.mxu0 }
 0x58c   : > { %v2235_v14 = vadd.f32 %v3371_v27, %v4761_v40  ;;  %v2326_v54 = vmax.f32 %v2224_v9, 0.0 }
 0x58d   : > { %v2226_v41 = vpop.f32.mrf.mxu0 }
 0x58e   : > { %v2227_v13 = vadd.f32 %v4761_v40, %v2226_v41  ;;  %v2329_v24 = vmax.f32 %v2235_v14, 0.0 }
 0x590   : > { %v2327_v51 = vmax.f32 %v2227_v13, 0.0  ;;  %v2355_v20 = vpack.c.bf16 %v2329_v24, %v2328_v22 }
 0x592   : > { %v2354_v37 = vpack.c.bf16 %v2327_v51, %v2326_v54 }
 0x594   : > { %3416 = vmatprep.mubr.bf16.mxu1 %v2354_v37 }
 0x595   : > { %3417 = vmatmul.mubr.bf16.gmra.mxu1 %v2355_v20 }
 0x597   : > { %v3374_v26 = vpop.f32.mrf.mxu0 }
 0x598   : > { %v2248_v5 = vadd.f32 %v3374_v26, %v4761_v40 }
 0x599   : > { %v2239_v53 = vpop.f32.mrf.mxu0 }
 0x59a   : > { %v2240_v10 = vadd.f32 %v4761_v40, %v2239_v53  ;;  %v2332_v57 = vmax.f32 %v2248_v5, 0.0 }
 0x59b   : > { %v3375_v43 = vpop.f32.mrf.mxu0 }
 0x59c   : > { %v2251_v21 = vadd.f32 %v3375_v43, %v4761_v40  ;;  %v2330_v58 = vmax.f32 %v2240_v10, 0.0 }
 0x59d   : > { %v2242_v8 = vpop.f32.mrf.mxu0 }
 0x59e   : > { %v2243_v28 = vadd.f32 %v4761_v40, %v2242_v8  ;;  %v2333_v3 = vmax.f32 %v2251_v21, 0.0 }
 0x5a0   : > { %v2331_v62 = vmax.f32 %v2243_v28, 0.0  ;;  %v2357_v45 = vpack.c.bf16 %v2333_v3, %v2332_v57 }
 0x5a2   : > { %v2356_v59 = vpack.c.bf16 %v2331_v62, %v2330_v58 }
 0x5a4   : > { %3420 = vmatprep.mubr.bf16.mxu1 %v2356_v59 }
 0x5a5   : > { %3421 = vmatmul.mubr.bf16.gmra.mxu1 %v2357_v45 }
 0x5a7   : > { %v3378_v60 = vpop.f32.mrf.mxu0 }
 0x5a8   : > { %v2264_v38 = vadd.f32 %v3378_v60, %v4761_v40 }
 0x5a9   : > { %v2255_v7 = vpop.f32.mrf.mxu0 }
 0x5aa   : > { %v2256_v49 = vadd.f32 %v4761_v40, %v2255_v7  ;;  %v2336_v46 = vmax.f32 %v2264_v38, 0.0 }
 0x5ab   : > { %v3379_v47 = vpop.f32.mrf.mxu0 }
 0x5ac   : > { %v2267_v42 = vadd.f32 %v3379_v47, %v4761_v40  ;;  %v2334_v52 = vmax.f32 %v2256_v49, 0.0 }
 0x5ad   : > { %v2258_v16 = vpop.f32.mrf.mxu0 }
 0x5ae   : > { %v2259_v50 = vadd.f32 %v4761_v40, %v2258_v16  ;;  %v2337_v0 = vmax.f32 %v2267_v42, 0.0 }
 0x5b0   : > { %v2335_v11 = vmax.f32 %v2259_v50, 0.0  ;;  %v2359_v39 = vpack.c.bf16 %v2337_v0, %v2336_v46 }
 0x5b2   : > { %v2358_v55 = vpack.c.bf16 %v2335_v11, %v2334_v52 }
 0x5b4   : > { %3424 = vmatprep.mubr.bf16.mxu1 %v2358_v55 }
 0x5b5   : > { %3425 = vmatmul.mubr.bf16.gmra.mxu1 %v2359_v39 }
 0x5b7   : > { %v3382_v36 = vpop.f32.mrf.mxu0 }
 0x5b8   : > { %v2280_v56 = vadd.f32 %v3382_v36, %v4761_v40 }
 0x5b9   : > { %v2271_v23 = vpop.f32.mrf.mxu0 }
 0x5ba   : > { %v2272_v33 = vadd.f32 %v4761_v40, %v2271_v23  ;;  %v2340_v6 = vmax.f32 %v2280_v56, 0.0 }
 0x5bb   : > { %v3383_v34 = vpop.f32.mrf.mxu0 }
 0x5bc   : > { %v2283_v17 = vadd.f32 %v3383_v34, %v4761_v40  ;;  %v2338_v4 = vmax.f32 %v2272_v33, 0.0 }
 0x5bd   : > { %v2274_v2 = vpop.f32.mrf.mxu0 }
 0x5be   : > { %v2275_v61 = vadd.f32 %v4761_v40, %v2274_v2  ;;  %v2341_v63 = vmax.f32 %v2283_v17, 0.0 }
 0x5c0   : > { %v2339_v12 = vmax.f32 %v2275_v61, 0.0  ;;  %v2361_v15 = vpack.c.bf16 %v2341_v63, %v2340_v6 }
 0x5c2   : > { %v2360_v1 = vpack.c.bf16 %v2339_v12, %v2338_v4 }
 0x5c4   : > { %3428 = vmatprep.mubr.bf16.mxu1 %v2360_v1 }
 0x5c5   : > { %3429 = vmatmul.mubr.bf16.gmra.mxu1 %v2361_v15 }
 0x5c7   : > { %v3386_v19 = vpop.f32.mrf.mxu0 }
 0x5c8   : > { %v2296_v48 = vadd.f32 %v3386_v19, %v4761_v40 }
 0x5c9   : > { %v2287_v30 = vpop.f32.mrf.mxu0 }
 0x5ca   : > { %v2288_v44 = vadd.f32 %v4761_v40, %v2287_v30  ;;  %v2344_v14 = vmax.f32 %v2296_v48, 0.0 }
 0x5cb   : > { %v3387_v32 = vpop.f32.mrf.mxu0 }
 0x5cc   : > { %v2299_v35 = vadd.f32 %v3387_v32, %v4761_v40  ;;  %v2342_v27 = vmax.f32 %v2288_v44, 0.0 }
 0x5cd   : > { %v2290_v29 = vpop.f32.mrf.mxu0 }
 0x5ce   : > { %v2291_v18 = vadd.f32 %v4761_v40, %v2290_v29  ;;  %v2345_v25 = vmax.f32 %v2299_v35, 0.0 }
 0x5d0   : > { %v2343_v9 = vmax.f32 %v2291_v18, 0.0  ;;  %v2363_v41 = vpack.c.bf16 %v2345_v25, %v2344_v14 }
 0x5d2   : > { %v2362_v31 = vpack.c.bf16 %v2343_v9, %v2342_v27 }
 0x5d4   : > { %3432 = vmatprep.mubr.bf16.mxu1 %v2362_v31 }
 0x5d5   : > { %3433 = vmatmul.mubr.bf16.gmra.mxu1 %v2363_v41 }
 0x5d7   : > { %v3390_v13 = vpop.f32.mrf.mxu0 }
 0x5d8   : > { %v2312_v37 = vadd.f32 %v3390_v13, %v4761_v40 }
 0x5d9   : > { %v2303_v24 = vpop.f32.mrf.mxu0 }
 0x5da   : > { %v2304_v51 = vadd.f32 %v4761_v40, %v2303_v24  ;;  %v2348_v21 = vmax.f32 %v2312_v37, 0.0 }
 0x5db   : > { %v3391_v54 = vpop.f32.mrf.mxu0 }
 0x5dc   : > { %v2315_v22 = vadd.f32 %v3391_v54, %v4761_v40  ;;  %v2346_v43 = vmax.f32 %v2304_v51, 0.0 }
 0x5dd   : > { %v2306_v20 = vpop.f32.mrf.mxu0 }
 0x5de   : > { %v2307_v26 = vadd.f32 %v4761_v40, %v2306_v20  ;;  %v2349_v53 = vmax.f32 %v2315_v22, 0.0  ;;  %v4807_v40 = vld [vmem:[%s4965_s9] ss:$0 sm:$0xff] }
 0x5e0   : > { %v2347_v10 = vmax.f32 %v2307_v26, 0.0  ;;  %v2365_v8 = vpack.c.bf16 %v2349_v53, %v2348_v21 }
 0x5e2   : > { %v2364_v5 = vpack.c.bf16 %v2347_v10, %v2346_v43 }
 0x5e4   : > { %3436 = vmatprep.mubr.bf16.mxu1 %v2364_v5 }
 0x5e5   : > { %3437 = vmatmul.mubr.bf16.gmra.mxu1 %v2365_v8 }
 0x5e6   : > { %3845 = shalt.err (!%p3842_p3)
}
 0x5e7   : > { %s3846_s30 = scalar_lea.hbm %s4801_s4, 4096  ;;  %s3850_s19 = scalar_lea.hbm %s4967_s11, 8192 }
 0x5e8   : > { %p3847_p8 = scmp.ne.s32.totalorder %s4801_s4, %s3846_s30  ;;  %p3851_p7 = scmp.lt.s32.totalorder %s4801_s4, %s4967_s11 }
 0x5e9   : > { %p3852_p1 = scmp.lt.s32.totalorder %s3850_s19, %s3846_s30 }
 0x5ea   : > { %p3848_p2 = pnand %p3847_p8, %p5043_p11 }
 0x5eb   : > { %p3853_p13 = por %p3852_p1, %p3851_p7 }
 0x5ec   : > { %p3849_p9 = pneg %p3848_p2 }
 0x5ee   : > { %p3854_p0 = pnand %p3853_p13, %p3849_p9 }
 0x5f0   : > { %3857 = shalt.err (!%p3854_p0)
}
 0x5f1   : > { %s3956_s24 = smov 128   ;;  %s3957_s28 = smov 8  }
 0x5f2   : > { %3461 = dma.vmem_to_hbm [thread:$0]  (%p5043_p11), %s4809_s2, 4096, %s4801_s4, %s2636_s25, %s3956_s24, %s3956_s24, %s3957_s28  }
 0x5f3   : > { %s4839_s0 = scalar_lea.vmem [#allocation13], %s4228_s22  ;;  %s4909_s25 = scalar_lea.hbm %s4966_s10, %s3037_s14 }
 0x5f4   : > { %s2650_s22 = sshll.u32 %s4839_s0, 4  ;;  %s2631_s15 = scalar_lea.sflag [#allocation4], %s4225_s16  ;;  %s4911_s22 = int_to_ptr.vmem [resolvable:$true] %s2650_s22 }
 0x5f5   : > { %s3858_s6 = scalar_lea.vmem %s4911_s22, 4096  ;;  %s3958_s23 = smov [#allocation13]  }
 0x5f6   : > { %p3859_p5 = scmp.ne.s32.totalorder %s4911_s22, %s3858_s6  ;;  %s3862_s8 = sshll.u32 %s3958_s23, 4  ;;  %s3863_s8 = int_to_ptr.vmem [resolvable:$false] %s3862_s8 }
 0x5f7   : > { %s3864_s21 = scalar_lea.vmem %s3863_s8, 8192  ;;  %p3865_p6 = scmp.lt.s32.totalorder %s4911_s22, %s3863_s8 }
 0x5f8   : > { %p3860_p12 = pnand %p3859_p5, %p5043_p11  ;;  %p3866_p10 = scmp.lt.s32.totalorder %s3864_s21, %s3858_s6 }
 0x5fa   : > { %p3861_p4 = pneg %p3860_p12  ;;  %p3867_p3 = por %p3866_p10, %p3865_p6 }
 0x5fc   : > { %p3868_p8 = pnand %p3867_p3, %p3861_p4 }
 0x635   : > { %v3410_v28 = vpop.f32.mrf.mxu1 }
 0x636   : > { %v2480_v3 = vadd.f32 %v3410_v28, %v4807_v40 }
 0x637   : > { %v2471_v58 = vpop.f32.mrf.mxu1 }
 0x638   : > { %2600 = vst [vmem:[%s4839_s0 + $0x10] sm:$0xff] %v2480_v3  ;;  %v2472_v62 = vadd.f32 %v4807_v40, %v2471_v58 }
 0x639   : > { %v3411_v57 = vpop.f32.mrf.mxu1 }
 0x63a   : > { %2598 = vst [vmem:[%s4839_s0] sm:$0xff] %v2472_v62  ;;  %v2483_v59 = vadd.f32 %v3411_v57, %v4807_v40 }
 0x63b   : > { %v2474_v45 = vpop.f32.mrf.mxu1 }
 0x63c   : > { %2601 = vst [vmem:[%s4839_s0 + $0x18] sm:$0xff] %v2483_v59  ;;  %v2475_v60 = vadd.f32 %v4807_v40, %v2474_v45 }
 0x63e   : > { %2599 = vst [vmem:[%s4839_s0 + $0x8] sm:$0xff] %v2475_v60 }
 0x645   : > { %v3414_v7 = vpop.f32.mrf.mxu1 }
 0x646   : > { %v2496_v47 = vadd.f32 %v3414_v7, %v4807_v40 }
 0x647   : > { %v2487_v49 = vpop.f32.mrf.mxu1 }
 0x648   : > { %2604 = vst [vmem:[%s4839_s0 + $0x30] sm:$0xff] %v2496_v47  ;;  %v2488_v42 = vadd.f32 %v4807_v40, %v2487_v49 }
 0x649   : > { %v3415_v38 = vpop.f32.mrf.mxu1 }
 0x64a   : > { %2602 = vst [vmem:[%s4839_s0 + $0x20] sm:$0xff] %v2488_v42  ;;  %v2499_v16 = vadd.f32 %v3415_v38, %v4807_v40 }
 0x64b   : > { %v2490_v50 = vpop.f32.mrf.mxu1 }
 0x64c   : > { %2605 = vst [vmem:[%s4839_s0 + $0x38] sm:$0xff] %v2499_v16  ;;  %v2491_v0 = vadd.f32 %v4807_v40, %v2490_v50 }
 0x64e   : > { %2603 = vst [vmem:[%s4839_s0 + $0x28] sm:$0xff] %v2491_v0 }
 0x655   : > { %v3418_v52 = vpop.f32.mrf.mxu1 }
 0x656   : > { %v2512_v11 = vadd.f32 %v3418_v52, %v4807_v40 }
 0x657   : > { %v2503_v46 = vpop.f32.mrf.mxu1 }
 0x658   : > { %2608 = vst [vmem:[%s4839_s0 + $0x50] sm:$0xff] %v2512_v11  ;;  %v2504_v55 = vadd.f32 %v4807_v40, %v2503_v46 }
 0x659   : > { %v3419_v39 = vpop.f32.mrf.mxu1 }
 0x65a   : > { %2606 = vst [vmem:[%s4839_s0 + $0x40] sm:$0xff] %v2504_v55  ;;  %v2515_v36 = vadd.f32 %v3419_v39, %v4807_v40 }
 0x65b   : > { %v2506_v23 = vpop.f32.mrf.mxu1 }
 0x65c   : > { %2609 = vst [vmem:[%s4839_s0 + $0x58] sm:$0xff] %v2515_v36  ;;  %v2507_v34 = vadd.f32 %v4807_v40, %v2506_v23 }
 0x65e   : > { %2607 = vst [vmem:[%s4839_s0 + $0x48] sm:$0xff] %v2507_v34 }
 0x665   : > { %v3422_v33 = vpop.f32.mrf.mxu1 }
 0x666   : > { %v2528_v17 = vadd.f32 %v3422_v33, %v4807_v40 }
 0x667   : > { %v2519_v56 = vpop.f32.mrf.mxu1 }
 0x668   : > { %2612 = vst [vmem:[%s4839_s0 + $0x70] sm:$0xff] %v2528_v17  ;;  %v2520_v2 = vadd.f32 %v4807_v40, %v2519_v56 }
 0x669   : > { %v3423_v61 = vpop.f32.mrf.mxu1 }
 0x66a   : > { %2610 = vst [vmem:[%s4839_s0 + $0x60] sm:$0xff] %v2520_v2  ;;  %v2531_v63 = vadd.f32 %v3423_v61, %v4807_v40 }
 0x66b   : > { %v2522_v4 = vpop.f32.mrf.mxu1 }
 0x66c   : > { %2613 = vst [vmem:[%s4839_s0 + $0x78] sm:$0xff] %v2531_v63  ;;  %v2523_v12 = vadd.f32 %v4807_v40, %v2522_v4 }
 0x66e   : > { %2611 = vst [vmem:[%s4839_s0 + $0x68] sm:$0xff] %v2523_v12 }
 0x675   : > { %v3426_v6 = vpop.f32.mrf.mxu1 }
 0x676   : > { %v2544_v1 = vadd.f32 %v3426_v6, %v4807_v40 }
 0x677   : > { %v2535_v15 = vpop.f32.mrf.mxu1 }
 0x678   : > { %2616 = vst [vmem:[%s4839_s0 + $0x90] sm:$0xff] %v2544_v1  ;;  %v2536_v19 = vadd.f32 %v4807_v40, %v2535_v15 }
 0x679   : > { %v3427_v30 = vpop.f32.mrf.mxu1 }
 0x67a   : > { %2614 = vst [vmem:[%s4839_s0 + $0x80] sm:$0xff] %v2536_v19  ;;  %v2547_v32 = vadd.f32 %v3427_v30, %v4807_v40 }
 0x67b   : > { %v2538_v44 = vpop.f32.mrf.mxu1 }
 0x67c   : > { %2617 = vst [vmem:[%s4839_s0 + $0x98] sm:$0xff] %v2547_v32  ;;  %v2539_v35 = vadd.f32 %v4807_v40, %v2538_v44 }
 0x67e   : > { %2615 = vst [vmem:[%s4839_s0 + $0x88] sm:$0xff] %v2539_v35 }
 0x685   : > { %v3430_v48 = vpop.f32.mrf.mxu1 }
 0x686   : > { %v2560_v29 = vadd.f32 %v3430_v48, %v4807_v40 }
 0x687   : > { %v2551_v18 = vpop.f32.mrf.mxu1 }
 0x688   : > { %2620 = vst [vmem:[%s4839_s0 + $0xb0] sm:$0xff] %v2560_v29  ;;  %v2552_v25 = vadd.f32 %v4807_v40, %v2551_v18 }
 0x689   : > { %v3431_v27 = vpop.f32.mrf.mxu1 }
 0x68a   : > { %2618 = vst [vmem:[%s4839_s0 + $0xa0] sm:$0xff] %v2552_v25  ;;  %v2563_v9 = vadd.f32 %v3431_v27, %v4807_v40 }
 0x68b   : > { %v2554_v14 = vpop.f32.mrf.mxu1 }
 0x68c   : > { %2621 = vst [vmem:[%s4839_s0 + $0xb8] sm:$0xff] %v2563_v9  ;;  %v2555_v31 = vadd.f32 %v4807_v40, %v2554_v14 }
 0x68e   : > { %2619 = vst [vmem:[%s4839_s0 + $0xa8] sm:$0xff] %v2555_v31 }
 0x695   : > { %v3434_v41 = vpop.f32.mrf.mxu1 }
 0x696   : > { %v2576_v13 = vadd.f32 %v3434_v41, %v4807_v40 }
 0x697   : > { %v2567_v24 = vpop.f32.mrf.mxu1 }
 0x698   : > { %2624 = vst [vmem:[%s4839_s0 + $0xd0] sm:$0xff] %v2576_v13  ;;  %v2568_v54 = vadd.f32 %v4807_v40, %v2567_v24 }
 0x699   : > { %v3435_v51 = vpop.f32.mrf.mxu1 }
 0x69a   : > { %2622 = vst [vmem:[%s4839_s0 + $0xc0] sm:$0xff] %v2568_v54  ;;  %v2579_v22 = vadd.f32 %v3435_v51, %v4807_v40 }
 0x69b   : > { %v2570_v37 = vpop.f32.mrf.mxu1 }
 0x69c   : > { %2625 = vst [vmem:[%s4839_s0 + $0xd8] sm:$0xff] %v2579_v22  ;;  %v2571_v20 = vadd.f32 %v4807_v40, %v2570_v37 }
 0x69e   : > { %2623 = vst [vmem:[%s4839_s0 + $0xc8] sm:$0xff] %v2571_v20 }
 0x6a5   : > { %v3438_v26 = vpop.f32.mrf.mxu1 }
 0x6a6   : > { %v2592_v53 = vadd.f32 %v3438_v26, %v4807_v40 }
 0x6a7   : > { %v2583_v43 = vpop.f32.mrf.mxu1 }
 0x6a8   : > { %2628 = vst [vmem:[%s4839_s0 + $0xf0] sm:$0xff] %v2592_v53  ;;  %v2584_v10 = vadd.f32 %v4807_v40, %v2583_v43 }
 0x6a9   : > { %v3439_v21 = vpop.f32.mrf.mxu1 }
 0x6aa   : > { %2626 = vst [vmem:[%s4839_s0 + $0xe0] sm:$0xff] %v2584_v10  ;;  %v2595_v5 = vadd.f32 %v3439_v21, %v4807_v40 }
 0x6ab   : > { %v2586_v8 = vpop.f32.mrf.mxu1 }
 0x6ac   : > { %2629 = vst [vmem:[%s4839_s0 + $0xf8] sm:$0xff] %v2595_v5  ;;  %v2587_v28 = vadd.f32 %v4807_v40, %v2586_v8 }
 0x6ae   : > { %2627 = vst [vmem:[%s4839_s0 + $0xe8] sm:$0xff] %v2587_v28 }
 0x6af   : > { %3871 = shalt.err (!%p3868_p8)
}
 0x6b0   : > { %s3872_s14 = scalar_lea.hbm %s4909_s25, 4096  ;;  %s3876_s13 = scalar_lea.hbm %s4966_s10, 8192 }
 0x6b1   : > { %p3873_p2 = scmp.ne.s32.totalorder %s4909_s25, %s3872_s14  ;;  %p3877_p1 = scmp.lt.s32.totalorder %s4909_s25, %s4966_s10 }
 0x6b2   : > { %p3878_p13 = scmp.lt.s32.totalorder %s3876_s13, %s3872_s14 }
 0x6b3   : > { %p3874_p9 = pnand %p3873_p2, %p5043_p11 }
 0x6b4   : > { %p3879_p0 = por %p3878_p13, %p3877_p1 }
 0x6b5   : > { %p3875_p7 = pneg %p3874_p9 }
 0x6b7   : > { %p3880_p5 = pnand %p3879_p0, %p3875_p7 }
 0x6b9   : > { %3883 = shalt.err (!%p3880_p5)
}
 0x6ba   : > { %3460 = dma.vmem_to_hbm [thread:$0]  (%p5043_p11), %s4911_s22, 4096, %s4909_s25, %s2631_s15, %s3956_s24, %s3956_s24, %s3957_s28  }
 0x6bb PF: > { %s5044_s26 = sld [smem:[#allocation24_spill]]  ;;  %s2682_s27 = sand.u32 1, %s3930_s17  }
 0x6bc   : > { %p5046_p4 = scmp.ge.s32.totalorder %s3942_s20, 2  ;;  %s2683_s0 = scalar_lea.sflag [#allocation4], %s2682_s27 }
 0x6c1   : > { %p5045_p12 = scmp.ne.s32.totalorder %s5044_s26, 0 }
 0x6c3   : > { %p3485_p6 = pnand %p5046_p4, %p5045_p12 }
 0x6c5   : > { %p3486_p10 = pneg %p3485_p6 }
 0x6c7   : > { %3921 = dma.done.wait (%p3486_p10), %s2683_s0, 4096  }
 0x6c8   : > { %3923 = vsyncadd (%p3486_p10), %s2683_s0, 4294963200  ;;  %s2692_s4 = scalar_lea.sflag [#allocation15], %s2682_s27 }
 0x6c9   : > { %3925 = dma.done.wait (%p3486_p10), %s2692_s4, 4096  }
 0x6ca   : > { %3927 = vsyncadd (%p3486_p10), %s2692_s4, 4294963200  ;;  %s5047_s20 = sld [smem:[#allocation25_spill]]  ;;  %s5050_s17 = smov %s3934_s18 }
 0x6cb   : > { %s5048_s29 = sld [smem:[#allocation23_spill]] }
 0x6cc   : > { %s5049_s19 = sld [smem:[#allocation26_spill]] }
 0x6d0   : > { %p33_p11 = scmp.ge.s32.totalorder %s5047_s20, 4  }
 0x6d1   : > { %s5051_s18 = smov %s5048_s29 }
 0x6d2   :  { %35 = sbr.rel (!%p33_p11) target bundleno = 17 (0x11), region = 153 }
 0x6d7   :  { %2697 = vsyncpa [#allocation3], 1 }
 0x6d8   :  { %2699 = vsyncpa [#allocation3 + $0x1], 1 }
 0x6d9   :  { %2700 = vsyncpa [#allocation6], 1 }
 0x6da   :  { %2702 = vsyncpa [#allocation6 + $0x1], 1 }
 0x6db   :  { %2703 = vsyncpa [#allocation9], 1 }
 0x6dc   :  { %2704 = vsyncpa [#allocation12], 1 }
 0x6dd   :  { %2705 = vsyncpa [#allocation4], 1 }
 0x6de   :  { %2707 = vsyncpa [#allocation4 + $0x1], 1 }
 0x6df   :  { %2708 = vsyncpa [#allocation15], 1 }
 0x6e0   :  { %2710 = vsyncpa [#allocation15 + $0x1], 1 }

</bundles_post_ra>
